<compile_context>
chip_gen: v7x
topology: tpu7x:2x2x1
jax: 0.10.0
libtpu: 0.0.40
codegen_flags: <defaults>
</compile_context>

<pallas_src>
import functools

import jax
import jax.numpy as jnp
from jax import lax
from jax.experimental import pallas as pl
from jax.experimental.pallas import tpu as pltpu

LEAKY_SLOPE = 0.01
BN_EPS = 1e-5
LANE = 128


def _round_up(n, m):
    return ((n + m - 1) // m) * m


def _pad2d(a, rows, cols, dtype):
    out = jnp.zeros((rows, cols), dtype)
    return out.at[: a.shape[0], : a.shape[1]].set(a.astype(dtype))


# --------------------------------------------------------------------------- #
# Kernel: 4x [dot + bias + LeakyReLU] + final dot + bias, one batch tile.
# All feature dims are pre-padded to multiples of 128 (zero pad -> exact).
# --------------------------------------------------------------------------- #
def _ffnn_kernel(x_ref, w1, b1, w2, b2, w3, b3, w4, b4, w5, b5, o_ref):
    w_dtype = w1.dtype
    h = x_ref[...].astype(w_dtype)
    for w_ref, b_ref in ((w1, b1), (w2, b2), (w3, b3), (w4, b4)):
        a = jnp.dot(h, w_ref[...], preferred_element_type=jnp.float32)
        a = a + b_ref[...]                          # folded BN+bias (f32)
        a = jnp.maximum(a, LEAKY_SLOPE * a)         # LeakyReLU(0.01), f32 VALU
        # Dropout: identity at inference.
        # TODO(synk): training-mode dropout (pltpu.prng_random_bits mask).
        h = a.astype(w_dtype)                       # matmul input in weight dtype
    out = jnp.dot(h, w5[...], preferred_element_type=jnp.float32)
    o_ref[...] = (out + b5[...]).astype(o_ref.dtype)


# --------------------------------------------------------------------------- #
# One-time parameter preparation: fold BN (eval mode) + bias into each Linear,
# cast weights to param_dtype (bf16 default), pad all dims to multiples of 128.
# --------------------------------------------------------------------------- #
def fold_params(raw_params, param_dtype=jnp.bfloat16):
    """raw_params = ([w, b, gamma, beta, mean, var] * 4, w5, b5).

    Weights are stored (in_features, out_features) so the kernel computes
    x @ W + b (== PyTorch x @ W.T + b for weight of shape (out, in)).
    """
    input_dim = raw_params[0].shape[0]
    hidden_dim = raw_params[0].shape[1]
    output_dim = raw_params[-1].shape[1]
    in_pad = _round_up(max(input_dim, LANE), LANE)
    hid_pad = _round_up(max(hidden_dim, LANE), LANE)
    out_pad = _round_up(max(output_dim, LANE), LANE)
    row_pads = (in_pad, hid_pad, hid_pad, hid_pad)

    folded = []
    idx = 0
    for rows in row_pads:
        w, b, gamma, beta, mean, var = raw_params[idx: idx + 6]
        idx += 6
        scale = gamma * lax.rsqrt(var + BN_EPS)                 # (1, hid)
        w_f = w * scale                                         # broadcast over rows
        b_f = (b - mean) * scale + beta
        folded.append(_pad2d(w_f, rows, hid_pad, param_dtype))
        folded.append(_pad2d(b_f, 1, hid_pad, jnp.float32))
    w5, b5 = raw_params[idx], raw_params[idx + 1]
    folded.append(_pad2d(w5, hid_pad, out_pad, param_dtype))
    folded.append(_pad2d(b5, 1, out_pad, jnp.float32))
    # TODO(synk): optional fp8 for the three hid x hid weights on v7x.
    return tuple(folded)


def _vmem_budget_bytes():
    """~75% of per-core physical VMEM (headroom for compiler scratch)."""
    try:
        cap = int(pltpu.get_tpu_info().vmem_capacity_bytes)
    except Exception:
        cap = 0
    if cap <= 0:
        cap = 64 << 20            # conservative default (v7x per-TC size)
    return (cap * 3) // 4


# --------------------------------------------------------------------------- #
# Wrapper: batch-tiled pallas_call with VMEM-budgeted tile size.
# --------------------------------------------------------------------------- #
@functools.partial(
    jax.jit,
    static_argnames=("output_dim", "block_rows", "single_buffer_params"))
def _feedforward_impl(x, folded_params, output_dim, block_rows,
                      single_buffer_params):
    batch, in_dim = x.shape
    w_dtype = folded_params[0].dtype
    in_pad = folded_params[0].shape[0]
    hid_pad = folded_params[0].shape[1]
    out_pad = folded_params[-1].shape[1]
    assert in_dim <= in_pad

    # Stream x in the weight dtype (halves activation DMA in bf16 mode).
    x = x.astype(w_dtype)
    if in_pad != in_dim:
        x = jnp.pad(x, ((0, 0), (0, in_pad - in_dim)))

    # ---- VMEM accounting -> batch tile size ------------------------------- #
    x_isz = jnp.dtype(w_dtype).itemsize
    param_bytes = sum(int(p.size) * p.dtype.itemsize for p in folded_params)
    param_resident = param_bytes * (1 if single_buffer_params else 2)
    budget = _vmem_budget_bytes()
    per_row = (2 * in_pad * x_isz            # double-buffered x tile
               + 2 * out_pad * 4             # double-buffered f32 out tile
               + 4 * hid_pad * 4)            # f32 intermediates + stored acts
    avail = budget - param_resident
    if avail <= 8 * per_row:
        # TODO(synk): K/N-tiled per-layer matmul path (emit_pipeline over the
        # hidden dim) once resident weights exceed per-core VMEM.
        raise NotImplementedError(
            "hidden_dim too large for resident-weight kernel")
    tb_cap = max(8, ((avail // per_row) // 8) * 8)

    b_pad8 = _round_up(batch, 8)
    tb = min(block_rows, tb_cap, b_pad8)
    # >= 2 grid steps when batch permits, so ("parallel",) uses both v7x TCs.
    half = _round_up(pl.cdiv(b_pad8, 2), 8)
    if b_pad8 >= 16 and tb > half:
        tb = half
    b_pad = _round_up(batch, tb)
    if b_pad != batch:
        x = jnp.pad(x, ((0, b_pad - batch), (0, 0)))
    grid = (b_pad // tb,)

    # ---- BlockSpecs -------------------------------------------------------- #
    in_specs = [pl.BlockSpec((tb, in_pad), lambda i: (i, 0))]        # x: tiled
    for p in folded_params:                                          # params: resident
        if single_buffer_params:
            spec = pl.BlockSpec(p.shape, lambda i: (0, 0),
                                pipeline_mode=pl.Buffered(1))
        else:
            spec = pl.BlockSpec(p.shape, lambda i: (0, 0))
        in_specs.append(spec)
    out_specs = pl.BlockSpec((tb, out_pad), lambda i: (i, 0))        # lane-dense

    flops = 2 * b_pad * (in_pad * hid_pad + 3 * hid_pad * hid_pad
                         + hid_pad * out_pad)
    bytes_accessed = param_bytes + int(x.size) * x_isz + b_pad * out_pad * 4
    vmem_limit = int(min(max(param_resident + tb * per_row + (4 << 20),
                             32 << 20), budget))

    out = pl.pallas_call(
        _ffnn_kernel,
        out_shape=jax.ShapeDtypeStruct((b_pad, out_pad), jnp.float32),
        grid=grid,
        in_specs=in_specs,
        out_specs=out_specs,
        compiler_params=pltpu.CompilerParams(
            dimension_semantics=("parallel",),
            vmem_limit_bytes=vmem_limit),
        cost_estimate=pl.CostEstimate(
            flops=flops, transcendentals=0, bytes_accessed=bytes_accessed),
    )(x, *folded_params)
    return out[:batch, :output_dim]


def feedforward_nn(x, folded_params, output_dim, block_rows=1024):
    """x: (B, input_dim).  folded_params: output of fold_params()."""
    if hasattr(pl, "Buffered"):
        try:
            return _feedforward_impl(x, folded_params, output_dim, block_rows,
                                     True)
        except NotImplementedError:
            raise
        except Exception:
            pass   # fall back if Buffered(1) pipeline_mode is unsupported
    return _feedforward_impl(x, folded_params, output_dim, block_rows, False)


# --------------------------------------------------------------------------- #
# Deterministic synthetic parameters matching the PyTorch module's shapes.
# --------------------------------------------------------------------------- #
def init_params(key, input_dim, hidden_dim, output_dim):
    dims = [(input_dim, hidden_dim),
            (hidden_dim, hidden_dim),
            (hidden_dim, hidden_dim),
            (hidden_dim, hidden_dim)]
    params = []
    keys = jax.random.split(key, 26)
    k_i = 0
    for (d_in, d_out) in dims:
        bound = 1.0 / jnp.sqrt(d_in)
        w = jax.random.uniform(keys[k_i], (d_in, d_out), jnp.float32, -bound, bound)
        b = jax.random.uniform(keys[k_i + 1], (1, d_out), jnp.float32, -bound, bound)
        gamma = 1.0 + 0.1 * jax.random.normal(keys[k_i + 2], (1, d_out), jnp.float32)
        beta = 0.1 * jax.random.normal(keys[k_i + 3], (1, d_out), jnp.float32)
        mean = 0.05 * jax.random.normal(keys[k_i + 4], (1, d_out), jnp.float32)
        var = jnp.abs(1.0 + 0.1 * jax.random.normal(keys[k_i + 5], (1, d_out),
                                                    jnp.float32))
        params += [w, b, gamma, beta, mean, var]
        k_i += 6
    bound = 1.0 / jnp.sqrt(hidden_dim)
    w5 = jax.random.uniform(keys[24], (hidden_dim, output_dim), jnp.float32,
                            -bound, bound)
    b5 = jax.random.uniform(keys[25], (1, output_dim), jnp.float32, -bound, bound)
    params += [w5, b5]
    return tuple(params)


def reference_forward(x, raw_params):
    """Pure-JAX reference with the original (unfolded) math."""
    h = x
    idx = 0
    for _ in range(4):
        w, b, gamma, beta, mean, var = raw_params[idx: idx + 6]
        idx += 6
        h = h @ w + b
        h = gamma * (h - mean) * lax.rsqrt(var + BN_EPS) + beta
        h = jnp.where(h >= 0, h, LEAKY_SLOPE * h)
    return h @ raw_params[idx] + raw_params[idx + 1]


if __name__ == "__main__":
    input_dim, hidden_dim, output_dim = 16, 32, 4
    batch = 8

    key = jax.random.PRNGKey(0)
    k_x, k_p = jax.random.split(key)
    x = jax.random.normal(k_x, (batch, input_dim), jnp.float32)
    raw_params = init_params(k_p, input_dim, hidden_dim, output_dim)
    ref = reference_forward(x, raw_params)

    # f32 weights: tight check against the unfolded reference.
    folded_f32 = fold_params(raw_params, param_dtype=jnp.float32)
    out_f32 = jax.block_until_ready(feedforward_nn(x, folded_f32, output_dim))
    assert out_f32.shape == (batch, output_dim), out_f32.shape
    assert jnp.allclose(out_f32, ref, atol=1e-4, rtol=1e-4), (
        float(jnp.max(jnp.abs(out_f32 - ref))))

    # bf16 weights/activations (default, MXU-native): loose check.
    folded_bf16 = fold_params(raw_params)
    out_bf16 = jax.block_until_ready(feedforward_nn(x, folded_bf16, output_dim))
    assert out_bf16.shape == (batch, output_dim), out_bf16.shape
    assert jnp.allclose(out_bf16, ref, atol=5e-2, rtol=5e-2), (
        float(jnp.max(jnp.abs(out_bf16 - ref))))

    print("KERNEL_OK")
</pallas_src>

<mosaic_0001>
module attributes {stable_mosaic.version = 11 : i64} {
  func.func @_ffnn_kernel(%arg0: i32, %arg1: memref<8x128xf32, #tpu.memory_space<vmem>>, %arg2: memref<128x128xf32, #tpu.memory_space<vmem>>, %arg3: memref<1x128xf32, #tpu.memory_space<vmem>>, %arg4: memref<128x128xf32, #tpu.memory_space<vmem>>, %arg5: memref<1x128xf32, #tpu.memory_space<vmem>>, %arg6: memref<128x128xf32, #tpu.memory_space<vmem>>, %arg7: memref<1x128xf32, #tpu.memory_space<vmem>>, %arg8: memref<128x128xf32, #tpu.memory_space<vmem>>, %arg9: memref<1x128xf32, #tpu.memory_space<vmem>>, %arg10: memref<128x128xf32, #tpu.memory_space<vmem>>, %arg11: memref<1x128xf32, #tpu.memory_space<vmem>>, %arg12: memref<8x128xf32, #tpu.memory_space<vmem>>) attributes {dimension_semantics = [#tpu.dimension_semantics<parallel>], iteration_bounds = array<i64: 1>, scalar_prefetch = 0 : i64, scratch_operands = 0 : i64, tpu.core_type = #tpu.core_type<tc>, window_params = [{transform_indices = @transform_0, window_bounds = array<i64: 8, 128>}, {pipeline_mode = #tpu.pipeline_mode<synchronous>, transform_indices = @transform_1, window_bounds = array<i64: 128, 128>}, {pipeline_mode = #tpu.pipeline_mode<synchronous>, transform_indices = @transform_2, window_bounds = array<i64: 1, 128>}, {pipeline_mode = #tpu.pipeline_mode<synchronous>, transform_indices = @transform_3, window_bounds = array<i64: 128, 128>}, {pipeline_mode = #tpu.pipeline_mode<synchronous>, transform_indices = @transform_4, window_bounds = array<i64: 1, 128>}, {pipeline_mode = #tpu.pipeline_mode<synchronous>, transform_indices = @transform_5, window_bounds = array<i64: 128, 128>}, {pipeline_mode = #tpu.pipeline_mode<synchronous>, transform_indices = @transform_6, window_bounds = array<i64: 1, 128>}, {pipeline_mode = #tpu.pipeline_mode<synchronous>, transform_indices = @transform_7, window_bounds = array<i64: 128, 128>}, {pipeline_mode = #tpu.pipeline_mode<synchronous>, transform_indices = @transform_8, window_bounds = array<i64: 1, 128>}, {pipeline_mode = #tpu.pipeline_mode<synchronous>, transform_indices = @transform_9, window_bounds = array<i64: 128, 128>}, {pipeline_mode = #tpu.pipeline_mode<synchronous>, transform_indices = @transform_10, window_bounds = array<i64: 1, 128>}, {transform_indices = @transform_11, window_bounds = array<i64: 8, 128>}]} {
    %c0 = arith.constant 0 : index
    %c0_0 = arith.constant 0 : index
    %0 = vector.load %arg1[%c0, %c0_0] : memref<8x128xf32, #tpu.memory_space<vmem>>, vector<8x128xf32>
    %c0_1 = arith.constant 0 : index
    %c0_2 = arith.constant 0 : index
    %1 = vector.load %arg2[%c0_1, %c0_2] : memref<128x128xf32, #tpu.memory_space<vmem>>, vector<128x128xf32>
    %cst = arith.constant dense<0.000000e+00> : vector<8x128xf32>
    %2 = tpu.matmul %0, %1, %cst {dimension_numbers = #tpu.dot_dimension_numbers<[1], [0], [0], [1], [0, 0, 1, 1], [], []>} : vector<8x128xf32>, vector<128x128xf32>, vector<8x128xf32> -> vector<8x128xf32>
    %c0_3 = arith.constant 0 : index
    %c0_4 = arith.constant 0 : index
    %3 = vector.load %arg3[%c0_3, %c0_4] : memref<1x128xf32, #tpu.memory_space<vmem>>, vector<1x128xf32>
    %4 = vector.broadcast %3 : vector<1x128xf32> to vector<8x128xf32>
    %5 = arith.addf %2, %4 : vector<8x128xf32>
    %cst_5 = arith.constant 0.00999999977 : f32
    %6 = vector.broadcast %cst_5 : f32 to vector<8x128xf32>
    %7 = arith.mulf %6, %5 : vector<8x128xf32>
    %8 = arith.maximumf %5, %7 : vector<8x128xf32>
    %c0_6 = arith.constant 0 : index
    %c0_7 = arith.constant 0 : index
    %9 = vector.load %arg4[%c0_6, %c0_7] : memref<128x128xf32, #tpu.memory_space<vmem>>, vector<128x128xf32>
    %cst_8 = arith.constant dense<0.000000e+00> : vector<8x128xf32>
    %10 = tpu.matmul %8, %9, %cst_8 {dimension_numbers = #tpu.dot_dimension_numbers<[1], [0], [0], [1], [0, 0, 1, 1], [], []>} : vector<8x128xf32>, vector<128x128xf32>, vector<8x128xf32> -> vector<8x128xf32>
    %c0_9 = arith.constant 0 : index
    %c0_10 = arith.constant 0 : index
    %11 = vector.load %arg5[%c0_9, %c0_10] : memref<1x128xf32, #tpu.memory_space<vmem>>, vector<1x128xf32>
    %12 = vector.broadcast %11 : vector<1x128xf32> to vector<8x128xf32>
    %13 = arith.addf %10, %12 : vector<8x128xf32>
    %cst_11 = arith.constant 0.00999999977 : f32
    %14 = vector.broadcast %cst_11 : f32 to vector<8x128xf32>
    %15 = arith.mulf %14, %13 : vector<8x128xf32>
    %16 = arith.maximumf %13, %15 : vector<8x128xf32>
    %c0_12 = arith.constant 0 : index
    %c0_13 = arith.constant 0 : index
    %17 = vector.load %arg6[%c0_12, %c0_13] : memref<128x128xf32, #tpu.memory_space<vmem>>, vector<128x128xf32>
    %cst_14 = arith.constant dense<0.000000e+00> : vector<8x128xf32>
    %18 = tpu.matmul %16, %17, %cst_14 {dimension_numbers = #tpu.dot_dimension_numbers<[1], [0], [0], [1], [0, 0, 1, 1], [], []>} : vector<8x128xf32>, vector<128x128xf32>, vector<8x128xf32> -> vector<8x128xf32>
    %c0_15 = arith.constant 0 : index
    %c0_16 = arith.constant 0 : index
    %19 = vector.load %arg7[%c0_15, %c0_16] : memref<1x128xf32, #tpu.memory_space<vmem>>, vector<1x128xf32>
    %20 = vector.broadcast %19 : vector<1x128xf32> to vector<8x128xf32>
    %21 = arith.addf %18, %20 : vector<8x128xf32>
    %cst_17 = arith.constant 0.00999999977 : f32
    %22 = vector.broadcast %cst_17 : f32 to vector<8x128xf32>
    %23 = arith.mulf %22, %21 : vector<8x128xf32>
    %24 = arith.maximumf %21, %23 : vector<8x128xf32>
    %c0_18 = arith.constant 0 : index
    %c0_19 = arith.constant 0 : index
    %25 = vector.load %arg8[%c0_18, %c0_19] : memref<128x128xf32, #tpu.memory_space<vmem>>, vector<128x128xf32>
    %cst_20 = arith.constant dense<0.000000e+00> : vector<8x128xf32>
    %26 = tpu.matmul %24, %25, %cst_20 {dimension_numbers = #tpu.dot_dimension_numbers<[1], [0], [0], [1], [0, 0, 1, 1], [], []>} : vector<8x128xf32>, vector<128x128xf32>, vector<8x128xf32> -> vector<8x128xf32>
    %c0_21 = arith.constant 0 : index
    %c0_22 = arith.constant 0 : index
    %27 = vector.load %arg9[%c0_21, %c0_22] : memref<1x128xf32, #tpu.memory_space<vmem>>, vector<1x128xf32>
    %28 = vector.broadcast %27 : vector<1x128xf32> to vector<8x128xf32>
    %29 = arith.addf %26, %28 : vector<8x128xf32>
    %cst_23 = arith.constant 0.00999999977 : f32
    %30 = vector.broadcast %cst_23 : f32 to vector<8x128xf32>
    %31 = arith.mulf %30, %29 : vector<8x128xf32>
    %32 = arith.maximumf %29, %31 : vector<8x128xf32>
    %c0_24 = arith.constant 0 : index
    %c0_25 = arith.constant 0 : index
    %33 = vector.load %arg10[%c0_24, %c0_25] : memref<128x128xf32, #tpu.memory_space<vmem>>, vector<128x128xf32>
    %cst_26 = arith.constant dense<0.000000e+00> : vector<8x128xf32>
    %34 = tpu.matmul %32, %33, %cst_26 {dimension_numbers = #tpu.dot_dimension_numbers<[1], [0], [0], [1], [0, 0, 1, 1], [], []>} : vector<8x128xf32>, vector<128x128xf32>, vector<8x128xf32> -> vector<8x128xf32>
    %c0_27 = arith.constant 0 : index
    %c0_28 = arith.constant 0 : index
    %35 = vector.load %arg11[%c0_27, %c0_28] : memref<1x128xf32, #tpu.memory_space<vmem>>, vector<1x128xf32>
    %36 = vector.broadcast %35 : vector<1x128xf32> to vector<8x128xf32>
    %37 = arith.addf %34, %36 : vector<8x128xf32>
    %c0_29 = arith.constant 0 : index
    %c0_30 = arith.constant 0 : index
    %38 = vector.load %arg12[%c0_29, %c0_30] : memref<8x128xf32, #tpu.memory_space<vmem>>, vector<8x128xf32>
    tpu.vector_store %arg12[%c0_29, %c0_30], %37 {strides = array<i32>} : memref<8x128xf32, #tpu.memory_space<vmem>>, vector<8x128xf32>,
    return
  }
  func.func @transform_0(%arg0: i32) -> (i32, i32) {
    %c0_i32 = arith.constant 0 : i32
    %c0_i32_0 = arith.constant 0 : i32
    return %arg0, %c0_i32 : i32, i32
  }
  func.func @transform_1(%arg0: i32) -> (i32, i32) {
    %c0_i32 = arith.constant 0 : i32
    %c0_i32_0 = arith.constant 0 : i32
    %c0_i32_1 = arith.constant 0 : i32
    return %c0_i32, %c0_i32_0 : i32, i32
  }
  func.func @transform_2(%arg0: i32) -> (i32, i32) {
    %c0_i32 = arith.constant 0 : i32
    %c0_i32_0 = arith.constant 0 : i32
    %c0_i32_1 = arith.constant 0 : i32
    return %c0_i32, %c0_i32_0 : i32, i32
  }
  func.func @transform_3(%arg0: i32) -> (i32, i32) {
    %c0_i32 = arith.constant 0 : i32
    %c0_i32_0 = arith.constant 0 : i32
    %c0_i32_1 = arith.constant 0 : i32
    return %c0_i32, %c0_i32_0 : i32, i32
  }
  func.func @transform_4(%arg0: i32) -> (i32, i32) {
    %c0_i32 = arith.constant 0 : i32
    %c0_i32_0 = arith.constant 0 : i32
    %c0_i32_1 = arith.constant 0 : i32
    return %c0_i32, %c0_i32_0 : i32, i32
  }
  func.func @transform_5(%arg0: i32) -> (i32, i32) {
    %c0_i32 = arith.constant 0 : i32
    %c0_i32_0 = arith.constant 0 : i32
    %c0_i32_1 = arith.constant 0 : i32
    return %c0_i32, %c0_i32_0 : i32, i32
  }
  func.func @transform_6(%arg0: i32) -> (i32, i32) {
    %c0_i32 = arith.constant 0 : i32
    %c0_i32_0 = arith.constant 0 : i32
    %c0_i32_1 = arith.constant 0 : i32
    return %c0_i32, %c0_i32_0 : i32, i32
  }
  func.func @transform_7(%arg0: i32) -> (i32, i32) {
    %c0_i32 = arith.constant 0 : i32
    %c0_i32_0 = arith.constant 0 : i32
    %c0_i32_1 = arith.constant 0 : i32
    return %c0_i32, %c0_i32_0 : i32, i32
  }
  func.func @transform_8(%arg0: i32) -> (i32, i32) {
    %c0_i32 = arith.constant 0 : i32
    %c0_i32_0 = arith.constant 0 : i32
    %c0_i32_1 = arith.constant 0 : i32
    return %c0_i32, %c0_i32_0 : i32, i32
  }
  func.func @transform_9(%arg0: i32) -> (i32, i32) {
    %c0_i32 = arith.constant 0 : i32
    %c0_i32_0 = arith.constant 0 : i32
    %c0_i32_1 = arith.constant 0 : i32
    return %c0_i32, %c0_i32_0 : i32, i32
  }
  func.func @transform_10(%arg0: i32) -> (i32, i32) {
    %c0_i32 = arith.constant 0 : i32
    %c0_i32_0 = arith.constant 0 : i32
    %c0_i32_1 = arith.constant 0 : i32
    return %c0_i32, %c0_i32_0 : i32, i32
  }
  func.func @transform_11(%arg0: i32) -> (i32, i32) {
    %c0_i32 = arith.constant 0 : i32
    %c0_i32_0 = arith.constant 0 : i32
    return %arg0, %c0_i32 : i32, i32
  }
}

module attributes {stable_mosaic.version = 11 : i64} {
  func.func @_ffnn_kernel(%arg0: i32, %arg1: memref<8x128xf32, #tpu.memory_space<vmem>>, %arg2: memref<128x128xf32, #tpu.memory_space<vmem>>, %arg3: memref<1x128xf32, #tpu.memory_space<vmem>>, %arg4: memref<128x128xf32, #tpu.memory_space<vmem>>, %arg5: memref<1x128xf32, #tpu.memory_space<vmem>>, %arg6: memref<128x128xf32, #tpu.memory_space<vmem>>, %arg7: memref<1x128xf32, #tpu.memory_space<vmem>>, %arg8: memref<128x128xf32, #tpu.memory_space<vmem>>, %arg9: memref<1x128xf32, #tpu.memory_space<vmem>>, %arg10: memref<128x128xf32, #tpu.memory_space<vmem>>, %arg11: memref<1x128xf32, #tpu.memory_space<vmem>>, %arg12: memref<8x128xf32, #tpu.memory_space<vmem>>) attributes {dimension_semantics = [#tpu.dimension_semantics<parallel>], iteration_bounds = array<i64: 1>, scalar_prefetch = 0 : i64, scratch_operands = 0 : i64, tpu.core_type = #tpu.core_type<tc>, window_params = [{transform_indices = @transform_0, window_bounds = array<i64: 8, 128>}, {pipeline_mode = #tpu.pipeline_mode<synchronous>, transform_indices = @transform_1, window_bounds = array<i64: 128, 128>}, {pipeline_mode = #tpu.pipeline_mode<synchronous>, transform_indices = @transform_2, window_bounds = array<i64: 1, 128>}, {pipeline_mode = #tpu.pipeline_mode<synchronous>, transform_indices = @transform_3, window_bounds = array<i64: 128, 128>}, {pipeline_mode = #tpu.pipeline_mode<synchronous>, transform_indices = @transform_4, window_bounds = array<i64: 1, 128>}, {pipeline_mode = #tpu.pipeline_mode<synchronous>, transform_indices = @transform_5, window_bounds = array<i64: 128, 128>}, {pipeline_mode = #tpu.pipeline_mode<synchronous>, transform_indices = @transform_6, window_bounds = array<i64: 1, 128>}, {pipeline_mode = #tpu.pipeline_mode<synchronous>, transform_indices = @transform_7, window_bounds = array<i64: 128, 128>}, {pipeline_mode = #tpu.pipeline_mode<synchronous>, transform_indices = @transform_8, window_bounds = array<i64: 1, 128>}, {pipeline_mode = #tpu.pipeline_mode<synchronous>, transform_indices = @transform_9, window_bounds = array<i64: 128, 128>}, {pipeline_mode = #tpu.pipeline_mode<synchronous>, transform_indices = @transform_10, window_bounds = array<i64: 1, 128>}, {transform_indices = @transform_11, window_bounds = array<i64: 8, 128>}]} {
    %c0 = arith.constant 0 : index
    %c0_0 = arith.constant 0 : index
    %0 = vector.load %arg1[%c0, %c0_0] : memref<8x128xf32, #tpu.memory_space<vmem>>, vector<8x128xf32>
    %c0_1 = arith.constant 0 : index
    %c0_2 = arith.constant 0 : index
    %1 = vector.load %arg2[%c0_1, %c0_2] : memref<128x128xf32, #tpu.memory_space<vmem>>, vector<128x128xf32>
    %cst = arith.constant dense<0.000000e+00> : vector<8x128xf32>
    %2 = tpu.matmul %0, %1, %cst {dimension_numbers = #tpu.dot_dimension_numbers<[1], [0], [0], [1], [0, 0, 1, 1], [], []>} : vector<8x128xf32>, vector<128x128xf32>, vector<8x128xf32> -> vector<8x128xf32>
    %c0_3 = arith.constant 0 : index
    %c0_4 = arith.constant 0 : index
    %3 = vector.load %arg3[%c0_3, %c0_4] : memref<1x128xf32, #tpu.memory_space<vmem>>, vector<1x128xf32>
    %4 = vector.broadcast %3 : vector<1x128xf32> to vector<8x128xf32>
    %5 = arith.addf %2, %4 : vector<8x128xf32>
    %cst_5 = arith.constant 0.00999999977 : f32
    %6 = vector.broadcast %cst_5 : f32 to vector<8x128xf32>
    %7 = arith.mulf %6, %5 : vector<8x128xf32>
    %8 = arith.maximumf %5, %7 : vector<8x128xf32>
    %c0_6 = arith.constant 0 : index
    %c0_7 = arith.constant 0 : index
    %9 = vector.load %arg4[%c0_6, %c0_7] : memref<128x128xf32, #tpu.memory_space<vmem>>, vector<128x128xf32>
    %cst_8 = arith.constant dense<0.000000e+00> : vector<8x128xf32>
    %10 = tpu.matmul %8, %9, %cst_8 {dimension_numbers = #tpu.dot_dimension_numbers<[1], [0], [0], [1], [0, 0, 1, 1], [], []>} : vector<8x128xf32>, vector<128x128xf32>, vector<8x128xf32> -> vector<8x128xf32>
    %c0_9 = arith.constant 0 : index
    %c0_10 = arith.constant 0 : index
    %11 = vector.load %arg5[%c0_9, %c0_10] : memref<1x128xf32, #tpu.memory_space<vmem>>, vector<1x128xf32>
    %12 = vector.broadcast %11 : vector<1x128xf32> to vector<8x128xf32>
    %13 = arith.addf %10, %12 : vector<8x128xf32>
    %cst_11 = arith.constant 0.00999999977 : f32
    %14 = vector.broadcast %cst_11 : f32 to vector<8x128xf32>
    %15 = arith.mulf %14, %13 : vector<8x128xf32>
    %16 = arith.maximumf %13, %15 : vector<8x128xf32>
    %c0_12 = arith.constant 0 : index
    %c0_13 = arith.constant 0 : index
    %17 = vector.load %arg6[%c0_12, %c0_13] : memref<128x128xf32, #tpu.memory_space<vmem>>, vector<128x128xf32>
    %cst_14 = arith.constant dense<0.000000e+00> : vector<8x128xf32>
    %18 = tpu.matmul %16, %17, %cst_14 {dimension_numbers = #tpu.dot_dimension_numbers<[1], [0], [0], [1], [0, 0, 1, 1], [], []>} : vector<8x128xf32>, vector<128x128xf32>, vector<8x128xf32> -> vector<8x128xf32>
    %c0_15 = arith.constant 0 : index
    %c0_16 = arith.constant 0 : index
    %19 = vector.load %arg7[%c0_15, %c0_16] : memref<1x128xf32, #tpu.memory_space<vmem>>, vector<1x128xf32>
    %20 = vector.broadcast %19 : vector<1x128xf32> to vector<8x128xf32>
    %21 = arith.addf %18, %20 : vector<8x128xf32>
    %cst_17 = arith.constant 0.00999999977 : f32
    %22 = vector.broadcast %cst_17 : f32 to vector<8x128xf32>
    %23 = arith.mulf %22, %21 : vector<8x128xf32>
    %24 = arith.maximumf %21, %23 : vector<8x128xf32>
    %c0_18 = arith.constant 0 : index
    %c0_19 = arith.constant 0 : index
    %25 = vector.load %arg8[%c0_18, %c0_19] : memref<128x128xf32, #tpu.memory_space<vmem>>, vector<128x128xf32>
    %cst_20 = arith.constant dense<0.000000e+00> : vector<8x128xf32>
    %26 = tpu.matmul %24, %25, %cst_20 {dimension_numbers = #tpu.dot_dimension_numbers<[1], [0], [0], [1], [0, 0, 1, 1], [], []>} : vector<8x128xf32>, vector<128x128xf32>, vector<8x128xf32> -> vector<8x128xf32>
    %c0_21 = arith.constant 0 : index
    %c0_22 = arith.constant 0 : index
    %27 = vector.load %arg9[%c0_21, %c0_22] : memref<1x128xf32, #tpu.memory_space<vmem>>, vector<1x128xf32>
    %28 = vector.broadcast %27 : vector<1x128xf32> to vector<8x128xf32>
    %29 = arith.addf %26, %28 : vector<8x128xf32>
    %cst_23 = arith.constant 0.00999999977 : f32
    %30 = vector.broadcast %cst_23 : f32 to vector<8x128xf32>
    %31 = arith.mulf %30, %29 : vector<8x128xf32>
    %32 = arith.maximumf %29, %31 : vector<8x128xf32>
    %c0_24 = arith.constant 0 : index
    %c0_25 = arith.constant 0 : index
    %33 = vector.load %arg10[%c0_24, %c0_25] : memref<128x128xf32, #tpu.memory_space<vmem>>, vector<128x128xf32>
    %cst_26 = arith.constant dense<0.000000e+00> : vector<8x128xf32>
    %34 = tpu.matmul %32, %33, %cst_26 {dimension_numbers = #tpu.dot_dimension_numbers<[1], [0], [0], [1], [0, 0, 1, 1], [], []>} : vector<8x128xf32>, vector<128x128xf32>, vector<8x128xf32> -> vector<8x128xf32>
    %c0_27 = arith.constant 0 : index
    %c0_28 = arith.constant 0 : index
    %35 = vector.load %arg11[%c0_27, %c0_28] : memref<1x128xf32, #tpu.memory_space<vmem>>, vector<1x128xf32>
    %36 = vector.broadcast %35 : vector<1x128xf32> to vector<8x128xf32>
    %37 = arith.addf %34, %36 : vector<8x128xf32>
    %c0_29 = arith.constant 0 : index
    %c0_30 = arith.constant 0 : index
    %38 = vector.load %arg12[%c0_29, %c0_30] : memref<8x128xf32, #tpu.memory_space<vmem>>, vector<8x128xf32>
    tpu.vector_store %arg12[%c0_29, %c0_30], %37 {strides = array<i32>} : memref<8x128xf32, #tpu.memory_space<vmem>>, vector<8x128xf32>,
    return
  }
  func.func @transform_0(%arg0: i32) -> (i32, i32) {
    %c0_i32 = arith.constant 0 : i32
    %c0_i32_0 = arith.constant 0 : i32
    return %arg0, %c0_i32 : i32, i32
  }
  func.func @transform_1(%arg0: i32) -> (i32, i32) {
    %c0_i32 = arith.constant 0 : i32
    %c0_i32_0 = arith.constant 0 : i32
    %c0_i32_1 = arith.constant 0 : i32
    return %c0_i32, %c0_i32_0 : i32, i32
  }
  func.func @transform_2(%arg0: i32) -> (i32, i32) {
    %c0_i32 = arith.constant 0 : i32
    %c0_i32_0 = arith.constant 0 : i32
    %c0_i32_1 = arith.constant 0 : i32
    return %c0_i32, %c0_i32_0 : i32, i32
  }
  func.func @transform_3(%arg0: i32) -> (i32, i32) {
    %c0_i32 = arith.constant 0 : i32
    %c0_i32_0 = arith.constant 0 : i32
    %c0_i32_1 = arith.constant 0 : i32
    return %c0_i32, %c0_i32_0 : i32, i32
  }
  func.func @transform_4(%arg0: i32) -> (i32, i32) {
    %c0_i32 = arith.constant 0 : i32
    %c0_i32_0 = arith.constant 0 : i32
    %c0_i32_1 = arith.constant 0 : i32
    return %c0_i32, %c0_i32_0 : i32, i32
  }
  func.func @transform_5(%arg0: i32) -> (i32, i32) {
    %c0_i32 = arith.constant 0 : i32
    %c0_i32_0 = arith.constant 0 : i32
    %c0_i32_1 = arith.constant 0 : i32
    return %c0_i32, %c0_i32_0 : i32, i32
  }
  func.func @transform_6(%arg0: i32) -> (i32, i32) {
    %c0_i32 = arith.constant 0 : i32
    %c0_i32_0 = arith.constant 0 : i32
    %c0_i32_1 = arith.constant 0 : i32
    return %c0_i32, %c0_i32_0 : i32, i32
  }
  func.func @transform_7(%arg0: i32) -> (i32, i32) {
    %c0_i32 = arith.constant 0 : i32
    %c0_i32_0 = arith.constant 0 : i32
    %c0_i32_1 = arith.constant 0 : i32
    return %c0_i32, %c0_i32_0 : i32, i32
  }
  func.func @transform_8(%arg0: i32) -> (i32, i32) {
    %c0_i32 = arith.constant 0 : i32
    %c0_i32_0 = arith.constant 0 : i32
    %c0_i32_1 = arith.constant 0 : i32
    return %c0_i32, %c0_i32_0 : i32, i32
  }
  func.func @transform_9(%arg0: i32) -> (i32, i32) {
    %c0_i32 = arith.constant 0 : i32
    %c0_i32_0 = arith.constant 0 : i32
    %c0_i32_1 = arith.constant 0 : i32
    return %c0_i32, %c0_i32_0 : i32, i32
  }
  func.func @transform_10(%arg0: i32) -> (i32, i32) {
    %c0_i32 = arith.constant 0 : i32
    %c0_i32_0 = arith.constant 0 : i32
    %c0_i32_1 = arith.constant 0 : i32
    return %c0_i32, %c0_i32_0 : i32, i32
  }
  func.func @transform_11(%arg0: i32) -> (i32, i32) {
    %c0_i32 = arith.constant 0 : i32
    %c0_i32_0 = arith.constant 0 : i32
    return %arg0, %c0_i32 : i32, i32
  }
}

</mosaic_0001>

<bundles_post_ra>
// kernel: _feedforward_impl.1
= control target key start
LH: loop header
LB: loop body
LE: loop exit
PB: predicated region body
PF: predicated region fallthrough
CT: control target
= control target key end

     0   :  { %16 = vsyncpa [#allocation3], 0  ;;  %s1329_s0 = inlined_call_operand.vmem [shape: f32[8,128], index: 0, kind: input, shape index: {}]   ;;  %s1330_s1 = inlined_call_operand.hbm [shape: f32[128,128], index: 1, kind: input, shape index: {}]   ;;  %s1331_s2 = inlined_call_operand.vmem [shape: f32[1,128], index: 2, kind: input, shape index: {}]   ;;  %s1332_s3 = inlined_call_operand.hbm [shape: f32[128,128], index: 3, kind: input, shape index: {}]   ;;  %s1333_s4 = inlined_call_operand.vmem [shape: f32[1,128], index: 4, kind: input, shape index: {}]   ;;  %s1334_s5 = inlined_call_operand.hbm [shape: f32[128,128], index: 5, kind: input, shape index: {}]   ;;  %s1335_s6 = inlined_call_operand.vmem [shape: f32[1,128], index: 6, kind: input, shape index: {}]   ;;  %s1336_s7 = inlined_call_operand.hbm [shape: f32[128,128], index: 7, kind: input, shape index: {}]   ;;  %s1337_s8 = inlined_call_operand.vmem [shape: f32[1,128], index: 8, kind: input, shape index: {}]   ;;  %s1338_s9 = inlined_call_operand.hbm [shape: f32[128,128], index: 9, kind: input, shape index: {}]   ;;  %s1339_s10 = inlined_call_operand.vmem [shape: f32[1,128], index: 10, kind: input, shape index: {}]   ;;  %s1340_s11 = inlined_call_operand.vmem [shape: f32[8,128], index: 11, kind: output, shape index: {}]  }
   0x1   :  { %17 = vsyncpa [#allocation5], 0 }
   0x2   :  { %18 = vsyncpa [#allocation8], 0  ;;  %s1099_s17 = smov [#allocation4]   ;;  %s1100_s19 = smov [#allocation7]  }
   0x3   :  { %s40_s18 = sshll.u32 %s1099_s17, 4  ;;  %s68_s20 = sshll.u32 %s1100_s19, 4  ;;  %s41_s18 = int_to_ptr.vmem [resolvable:$true] %s40_s18  ;;  %s1169_s20 = int_to_ptr.vmem [resolvable:$true] %s68_s20 }
   0x4   :  { %s983_s23 = scalar_lea.hbm %s1332_s3, 2048 }
   0x5   :  { %p984_p0 = scmp.ne.s32.totalorder %s1332_s3, %s983_s23  ;;  %p987_p1 = scmp.lt.u32.totalorder %s983_s23, %s1332_s3 }
   0x7   :  { %p989_p2 = pnand %p987_p1, %p984_p0 }
   0x9   :  { %992 = shalt.err (!%p989_p2)
}
   0xa   :  { %s993_s28 = scalar_lea.vmem %s41_s18, 2048  ;;  %p998_p4 = scmp.lt.s32.totalorder %s41_s18, %s41_s18 }
   0xb   :  { %p994_p3 = scmp.ne.s32.totalorder %s41_s18, %s993_s28  ;;  %p999_p5 = scmp.lt.s32.totalorder %s993_s28, %s993_s28 }
   0xd   :  { %p1000_p6 = por %p999_p5, %p998_p4 }
   0xf   :  { %p1001_p7 = pnand %p1000_p6, %p994_p3 }
  0x11   :  { %1004 = shalt.err (!%p1001_p7)
}
  0x12   :  { %s1101_s29 = smov 128   ;;  %s1102_s30 = smov 8  }
  0x13   :  { %46 = dma.hbm_to_vmem [thread:$0]  %s1332_s3, 2048, %s41_s18, [#allocation5], %s1101_s29, %s1101_s29, %s1102_s30  }
  0x14   :  { %s1005_s16 = scalar_lea.hbm %s1336_s7, 2048 }
  0x15   :  { %p1006_p8 = scmp.ne.s32.totalorder %s1336_s7, %s1005_s16  ;;  %p1009_p9 = scmp.lt.u32.totalorder %s1005_s16, %s1336_s7 }
  0x17   :  { %p1011_p10 = pnand %p1009_p9, %p1006_p8 }
  0x19   :  { %1014 = shalt.err (!%p1011_p10)
}
  0x1a   :  { %s1015_s23 = scalar_lea.vmem %s1169_s20, 2048  ;;  %p1020_p12 = scmp.lt.s32.totalorder %s1169_s20, %s1169_s20 }
  0x1b   :  { %p1016_p11 = scmp.ne.s32.totalorder %s1169_s20, %s1015_s23  ;;  %p1021_p13 = scmp.lt.s32.totalorder %s1015_s23, %s1015_s23 }
  0x1d   :  { %p1022_p0 = por %p1021_p13, %p1020_p12 }
  0x1f   :  { %p1023_p1 = pnand %p1022_p0, %p1016_p11 }
  0x21   :  { %1026 = shalt.err (!%p1023_p1)
}
  0x22   :  { %74 = dma.hbm_to_vmem [thread:$0]  %s1336_s7, 2048, %s1169_s20, [#allocation8], %s1101_s29, %s1101_s29, %s1102_s30  }
  0x23   :  { %s1103_s24 = smov [#allocation2]   ;;  %s1104_s26 = smov [#allocation6]  }
  0x24   :  { %s26_s25 = sshll.u32 %s1103_s24, 4  ;;  %s54_s27 = sshll.u32 %s1104_s26, 4  ;;  %s27_s25 = int_to_ptr.vmem [resolvable:$true] %s26_s25  ;;  %s1206_s27 = int_to_ptr.vmem [resolvable:$true] %s54_s27 }
  0x25   :  { %s1027_s13 = scalar_lea.hbm %s1330_s1, 2048 }
  0x26   :  { %p1028_p2 = scmp.ne.s32.totalorder %s1330_s1, %s1027_s13  ;;  %p1031_p3 = scmp.lt.u32.totalorder %s1027_s13, %s1330_s1 }
  0x28   :  { %p1033_p4 = pnand %p1031_p3, %p1028_p2 }
  0x2a   :  { %1036 = shalt.err (!%p1033_p4)
}
  0x2b   :  { %s1037_s7 = scalar_lea.vmem %s27_s25, 2048  ;;  %p1042_p6 = scmp.lt.s32.totalorder %s27_s25, %s27_s25 }
  0x2c   :  { %p1038_p5 = scmp.ne.s32.totalorder %s27_s25, %s1037_s7  ;;  %p1043_p7 = scmp.lt.s32.totalorder %s1037_s7, %s1037_s7 }
  0x2e   :  { %p1044_p8 = por %p1043_p7, %p1042_p6 }
  0x30   :  { %p1045_p9 = pnand %p1044_p8, %p1038_p5 }
  0x32   :  { %1048 = shalt.err (!%p1045_p9)
}
  0x33   :  { %32 = dma.hbm_to_vmem [thread:$0]  %s1330_s1, 2048, %s27_s25, [#allocation3], %s1101_s29, %s1101_s29, %s1102_s30  }
  0x34   :  { %s1049_s23 = scalar_lea.hbm %s1334_s5, 2048 }
  0x35   :  { %p1050_p10 = scmp.ne.s32.totalorder %s1334_s5, %s1049_s23  ;;  %p1053_p11 = scmp.lt.u32.totalorder %s1049_s23, %s1334_s5 }
  0x37   :  { %p1055_p12 = pnand %p1053_p11, %p1050_p10 }
  0x39   :  { %1058 = shalt.err (!%p1055_p12)
}
  0x3a   :  { %s1059_s28 = scalar_lea.vmem %s1206_s27, 2048  ;;  %p1064_p0 = scmp.lt.s32.totalorder %s1206_s27, %s1206_s27 }
  0x3b   :  { %p1060_p13 = scmp.ne.s32.totalorder %s1206_s27, %s1059_s28  ;;  %p1065_p1 = scmp.lt.s32.totalorder %s1059_s28, %s1059_s28 }
  0x3d   :  { %p1066_p2 = por %p1065_p1, %p1064_p0 }
  0x3f   :  { %p1067_p3 = pnand %p1066_p2, %p1060_p13 }
  0x41   :  { %1070 = shalt.err (!%p1067_p3)
}
  0x42   :  { %60 = dma.hbm_to_vmem [thread:$0]  %s1334_s5, 2048, %s1206_s27, [#allocation5], %s1101_s29, %s1101_s29, %s1102_s30  }
  0x43   :  { %s1105_s12 = smov [#allocation9]   ;;  %s1071_s16 = scalar_lea.hbm %s1338_s9, 2048 }
  0x44   :  { %s82_s13 = sshll.u32 %s1105_s12, 4  ;;  %p1072_p4 = scmp.ne.s32.totalorder %s1338_s9, %s1071_s16  ;;  %s83_s13 = int_to_ptr.vmem [resolvable:$true] %s82_s13 }
  0x45   :  { %p1075_p5 = scmp.lt.u32.totalorder %s1071_s16, %s1338_s9 }
  0x47   :  { %p1077_p6 = pnand %p1075_p5, %p1072_p4 }
  0x49   :  { %1080 = shalt.err (!%p1077_p6)
}
  0x4a   :  { %s1081_s21 = scalar_lea.vmem %s83_s13, 2048  ;;  %p1086_p8 = scmp.lt.s32.totalorder %s83_s13, %s83_s13 }
  0x4b   :  { %p1082_p7 = scmp.ne.s32.totalorder %s83_s13, %s1081_s21  ;;  %p1087_p9 = scmp.lt.s32.totalorder %s1081_s21, %s1081_s21 }
  0x4d   :  { %p1088_p10 = por %p1087_p9, %p1086_p8 }
  0x4f   :  { %p1089_p11 = pnand %p1088_p10, %p1082_p7 }
  0x51   :  { %1092 = shalt.err (!%p1089_p11)
}
  0x52   :  { %88 = dma.hbm_to_vmem [thread:$0]  %s1338_s9, 2048, %s83_s13, [#allocation8], %s1101_s29, %s1101_s29, %s1102_s30  }
  0x53   :  { %1093 = dma.done.wait [#allocation3], 2048  }
  0x54   :  { %1094 = vsyncadd [#allocation3], 4294965248 }
  0x55   :  { %1095 = dma.done.wait [#allocation5], 4096  }
  0x56   :  { %1096 = vsyncadd [#allocation5], 4294963200 }
  0x57   :  { %1097 = dma.done.wait [#allocation8], 4096  }
  0x58   :  { %1098 = vsyncadd [#allocation8], 4294963200  ;;  %v1106_v0 = vmov 0.0|0.0   ;;  %vm1107_vm0 = vmmov 0   ;;  %v1108_v1 = vmov 0.0   ;;  %v107_v2 = vld [vmem:[#allocation2] sm:$0xff] }
  0x59   :  { %853 = vmatprep.subr.bf16.mxu0 %v1106_v0  ;;  %710 = vmatprep.mubr.msk.f32.mxu0 %vm1107_vm0, %v1108_v1  ;;  %v108_v3 = vld [vmem:[#allocation2 + $0x8] sm:$0xff]  ;;  %v109_v4 = vld [vmem:[#allocation2 + $0x10] sm:$0xff]  ;;  %v110_v6 = vld [vmem:[#allocation2 + $0x18] sm:$0xff] }
  0x5a   :  { %877 = vmatprep.subr.bf16.mxu1 %v1106_v0  ;;  %745 = vmatprep.mubr.msk.f32.mxu1 %vm1107_vm0, %v1108_v1  ;;  %v854_v5 = vpack.c.bf16 %v108_v3, %v107_v2  ;;  %v857_v7 = vpack.c.bf16 %v110_v6, %v109_v4  ;;  %v111_v8 = vld [vmem:[#allocation2 + $0x20] sm:$0xff]  ;;  %v112_v9 = vld [vmem:[#allocation2 + $0x28] sm:$0xff]  ;;  %v204_v12 = vld [vmem:[#allocation4 + $0x10] sm:$0xff] }
  0x5b   :  { %v202_v10 = vld [vmem:[#allocation4] sm:$0xff]  ;;  %v203_v11 = vld [vmem:[#allocation4 + $0x8] sm:$0xff]  ;;  %v205_v13 = vld [vmem:[#allocation4 + $0x18] sm:$0xff]  ;;  %v860_v14 = vpack.c.bf16 %v112_v9, %v111_v8 }
  0x5c   :  { %855 = vmatpush3.bf16.msra.mxu0 %v854_v5  ;;  %v878_v15 = vpack.c.bf16 %v203_v11, %v202_v10  ;;  %v113_v16 = vld [vmem:[#allocation2 + $0x30] sm:$0xff]  ;;  %v114_v17 = vld [vmem:[#allocation2 + $0x38] sm:$0xff]  ;;  %v881_v18 = vpack.c.bf16 %v205_v13, %v204_v12  ;;  %v206_v19 = vld [vmem:[#allocation4 + $0x20] sm:$0xff] }
  0x5d   :  { %856 = vmatprep.subr.bf16.mxu0 %v1106_v0  ;;  %v207_v20 = vld [vmem:[#allocation4 + $0x28] sm:$0xff]  ;;  %v863_v21 = vpack.c.bf16 %v114_v17, %v113_v16  ;;  %v115_v22 = vld [vmem:[#allocation2 + $0x40] sm:$0xff]  ;;  %v208_v25 = vld [vmem:[#allocation4 + $0x30] sm:$0xff] }
  0x5e   :  { %879 = vmatpush3.bf16.msra.mxu1 %v878_v15  ;;  %v116_v23 = vld [vmem:[#allocation2 + $0x48] sm:$0xff]  ;;  %v884_v24 = vpack.c.bf16 %v207_v20, %v206_v19  ;;  %v209_v26 = vld [vmem:[#allocation4 + $0x38] sm:$0xff]  ;;  %v117_v28 = vld [vmem:[#allocation2 + $0x50] sm:$0xff] }
  0x5f   :  { %880 = vmatprep.subr.bf16.mxu1 %v1106_v0  ;;  %v866_v27 = vpack.c.bf16 %v116_v23, %v115_v22  ;;  %v118_v29 = vld [vmem:[#allocation2 + $0x58] sm:$0xff]  ;;  %v887_v30 = vpack.c.bf16 %v209_v26, %v208_v25  ;;  %v210_v31 = vld [vmem:[#allocation4 + $0x40] sm:$0xff]  ;;  %v211_v32 = vld [vmem:[#allocation4 + $0x48] sm:$0xff] }
  0x60   :  { %858 = vmatpush3.bf16.msra.mxu0 %v857_v7  ;;  %v869_v33 = vpack.c.bf16 %v118_v29, %v117_v28  ;;  %v119_v34 = vld [vmem:[#allocation2 + $0x60] sm:$0xff]  ;;  %v120_v35 = vld [vmem:[#allocation2 + $0x68] sm:$0xff]  ;;  %v890_v36 = vpack.c.bf16 %v211_v32, %v210_v31  ;;  %v212_v37 = vld [vmem:[#allocation4 + $0x50] sm:$0xff] }
  0x61   :  { %859 = vmatprep.subr.bf16.mxu0 %v1106_v0  ;;  %v213_v38 = vld [vmem:[#allocation4 + $0x58] sm:$0xff]  ;;  %v872_v39 = vpack.c.bf16 %v120_v35, %v119_v34  ;;  %v121_v40 = vld [vmem:[#allocation2 + $0x70] sm:$0xff]  ;;  %v106_v44 = vld [vmem:[%s1329_s0] sm:$0xff] }
  0x62   :  { %882 = vmatpush3.bf16.msra.mxu1 %v881_v18  ;;  %v122_v41 = vld [vmem:[#allocation2 + $0x78] sm:$0xff]  ;;  %v893_v42 = vpack.c.bf16 %v213_v38, %v212_v37  ;;  %v214_v45 = vld [vmem:[#allocation4 + $0x60] sm:$0xff]  ;;  %v215_v46 = vld [vmem:[#allocation4 + $0x68] sm:$0xff] }
  0x63   :  { %883 = vmatprep.subr.bf16.mxu1 %v1106_v0  ;;  %v875_v43 = vpack.c.bf16 %v122_v41, %v121_v40  ;;  %v896_v47 = vpack.c.bf16 %v215_v46, %v214_v45  ;;  %v216_v48 = vld [vmem:[#allocation4 + $0x70] sm:$0xff]  ;;  %v217_v49 = vld [vmem:[#allocation4 + $0x78] sm:$0xff]  ;;  %v297_v51 = vld [vmem:[#allocation6] sm:$0xff] }
  0x64   :  { %861 = vmatpush3.bf16.msra.mxu0 %v860_v14  ;;  %v899_v50 = vpack.c.bf16 %v217_v49, %v216_v48  ;;  %v298_v52 = vld [vmem:[#allocation6 + $0x8] sm:$0xff]  ;;  %v299_v53 = vld [vmem:[#allocation6 + $0x10] sm:$0xff]  ;;  %v300_v55 = vld [vmem:[#allocation6 + $0x18] sm:$0xff] }
  0x65   :  { %862 = vmatprep.subr.bf16.mxu0 %v1106_v0  ;;  %v902_v54 = vpack.c.bf16 %v298_v52, %v297_v51  ;;  %v905_v56 = vpack.c.bf16 %v300_v55, %v299_v53  ;;  %v301_v57 = vld [vmem:[#allocation6 + $0x20] sm:$0xff]  ;;  %v302_v58 = vld [vmem:[#allocation6 + $0x28] sm:$0xff]  ;;  %v303_v60 = vld [vmem:[#allocation6 + $0x30] sm:$0xff] }
  0x66   :  { %885 = vmatpush3.bf16.msra.mxu1 %v884_v24  ;;  %v908_v59 = vpack.c.bf16 %v302_v58, %v301_v57  ;;  %v304_v61 = vld [vmem:[#allocation6 + $0x38] sm:$0xff]  ;;  %v305_v63 = vld [vmem:[#allocation6 + $0x40] sm:$0xff]  ;;  %v306_v2 = vld [vmem:[#allocation6 + $0x48] sm:$0xff] }
  0x67   :  { %886 = vmatprep.subr.bf16.mxu1 %v1106_v0  ;;  %v911_v62 = vpack.c.bf16 %v304_v61, %v303_v60  ;;  %v914_v3 = vpack.c.bf16 %v306_v2, %v305_v63  ;;  %v307_v4 = vld [vmem:[#allocation6 + $0x50] sm:$0xff]  ;;  %v308_v5 = vld [vmem:[#allocation6 + $0x58] sm:$0xff]  ;;  %v588_v7 = vld [vmem:[%s1331_s2] ss:$0 sm:$0xff] }
  0x68   :  { %864 = vmatpush3.bf16.msra.mxu0 %v863_v21  ;;  %v917_v6 = vpack.c.bf16 %v308_v5, %v307_v4  ;;  %v309_v13 = vld [vmem:[#allocation6 + $0x60] sm:$0xff]  ;;  %v310_v14 = vld [vmem:[#allocation6 + $0x68] sm:$0xff]  ;;  %v311_v16 = vld [vmem:[#allocation6 + $0x70] sm:$0xff] }
  0x69   :  { %865 = vmatprep.subr.bf16.mxu0 %v1106_v0  ;;  %v920_v15 = vpack.c.bf16 %v310_v14, %v309_v13  ;;  %v312_v17 = vld [vmem:[#allocation6 + $0x78] sm:$0xff]  ;;  %v392_v19 = vld [vmem:[#allocation7] sm:$0xff]  ;;  %v393_v20 = vld [vmem:[#allocation7 + $0x8] sm:$0xff] }
  0x6a   :  { %888 = vmatpush3.bf16.msra.mxu1 %v887_v30  ;;  %v923_v18 = vpack.c.bf16 %v312_v17, %v311_v16  ;;  %v394_v21 = vld [vmem:[#allocation7 + $0x10] sm:$0xff]  ;;  %v926_v22 = vpack.c.bf16 %v393_v20, %v392_v19  ;;  %v395_v23 = vld [vmem:[#allocation7 + $0x18] sm:$0xff]  ;;  %v396_v25 = vld [vmem:[#allocation7 + $0x20] sm:$0xff] }
  0x6b   :  { %889 = vmatprep.subr.bf16.mxu1 %v1106_v0  ;;  %v929_v24 = vpack.c.bf16 %v395_v23, %v394_v21  ;;  %v397_v26 = vld [vmem:[#allocation7 + $0x28] sm:$0xff]  ;;  %v398_v28 = vld [vmem:[#allocation7 + $0x30] sm:$0xff]  ;;  %v399_v29 = vld [vmem:[#allocation7 + $0x38] sm:$0xff] }
  0x6c   :  { %867 = vmatpush3.bf16.msra.mxu0 %v866_v27  ;;  %v932_v27 = vpack.c.bf16 %v397_v26, %v396_v25  ;;  %v935_v30 = vpack.c.bf16 %v399_v29, %v398_v28  ;;  %v400_v31 = vld [vmem:[#allocation7 + $0x40] sm:$0xff]  ;;  %v401_v32 = vld [vmem:[#allocation7 + $0x48] sm:$0xff]  ;;  %v402_v34 = vld [vmem:[#allocation7 + $0x50] sm:$0xff] }
  0x6d   :  { %868 = vmatprep.subr.bf16.mxu0 %v1106_v0  ;;  %v403_v35 = vld [vmem:[#allocation7 + $0x58] sm:$0xff]  ;;  %v589_v37 = vld [vmem:[%s1333_s4] ss:$0 sm:$0xff]  ;;  %v406_v46 = vld [vmem:[#allocation7 + $0x70] sm:$0xff] }
  0x6e   :  { %891 = vmatpush3.bf16.msra.mxu1 %v890_v36  ;;  %v941_v36 = vpack.c.bf16 %v403_v35, %v402_v34  ;;  %v487_v49 = vld [vmem:[#allocation9] sm:$0xff]  ;;  %v489_v51 = vld [vmem:[#allocation9 + $0x10] sm:$0xff]  ;;  %v490_v53 = vld [vmem:[#allocation9 + $0x18] sm:$0xff] }
  0x6f   :  { %892 = vmatprep.subr.bf16.mxu1 %v1106_v0  ;;  %v492_v55 = vld [vmem:[#allocation9 + $0x28] sm:$0xff]  ;;  %v493_v57 = vld [vmem:[#allocation9 + $0x30] sm:$0xff]  ;;  %v494_v58 = vld [vmem:[#allocation9 + $0x38] sm:$0xff] }
  0x70   :  { %870 = vmatpush3.bf16.msra.mxu0 %v869_v33  ;;  %v938_v33 = vpack.c.bf16 %v401_v32, %v400_v31  ;;  %v495_v60 = vld [vmem:[#allocation9 + $0x40] sm:$0xff]  ;;  %v496_v61 = vld [vmem:[#allocation9 + $0x48] sm:$0xff]  ;;  %v497_v63 = vld [vmem:[#allocation9 + $0x50] sm:$0xff] }
  0x71   :  { %871 = vmatprep.subr.bf16.mxu0 %v1106_v0  ;;  %v498_v2 = vld [vmem:[#allocation9 + $0x58] sm:$0xff]  ;;  %v590_v4 = vld [vmem:[%s1335_s6] ss:$0 sm:$0xff]  ;;  %v501_v13 = vld [vmem:[#allocation9 + $0x70] sm:$0xff] }
  0x72   :  { %894 = vmatpush3.bf16.msra.mxu1 %v893_v42  ;;  %v502_v14 = vld [vmem:[#allocation9 + $0x78] sm:$0xff]  ;;  %v591_v16 = vld [vmem:[%s1337_s8] ss:$0 sm:$0xff] }
  0x73   :  { %895 = vmatprep.subr.bf16.mxu1 %v1106_v0 }
  0x74   :  { %873 = vmatpush3.bf16.msra.mxu0 %v872_v39 }
  0x75   :  { %874 = vmatprep.subr.bf16.mxu0 %v1106_v0 }
  0x76   :  { %897 = vmatpush3.bf16.msra.mxu1 %v896_v47  ;;  %v407_v47 = vld [vmem:[#allocation7 + $0x78] sm:$0xff] }
  0x77   :  { %898 = vmatprep.subr.bf16.mxu1 %v1106_v0  ;;  %v947_v48 = vpack.c.bf16 %v407_v47, %v406_v46 }
  0x78   :  { %876 = vmatpush3.bf16.msra.mxu0 %v875_v43  ;;  %v404_v43 = vld [vmem:[#allocation7 + $0x60] sm:$0xff] }
  0x79   :  { %901 = vmatprep.subr.bf16.mxu0 %v1106_v0 }
  0x7a   :  { %900 = vmatpush3.bf16.msra.mxu1 %v899_v50  ;;  %v488_v50 = vld [vmem:[#allocation9 + $0x8] sm:$0xff] }
  0x7b   :  { %711 = vmatmul.mubr.f32.vlgmr.msra.gmra.mrb[0].mxu0 %v106_v44  ;;  %925 = vmatprep.subr.bf16.mxu1 %v1106_v0  ;;  %v405_v44 = vld [vmem:[#allocation7 + $0x68] sm:$0xff]  ;;  %v950_v52 = vpack.c.bf16 %v488_v50, %v487_v49 }
  0x7c   :  { %780 = vmatprep.mubr.msk.f32.mxu0 %vm1107_vm0, %v1108_v1  ;;  %903 = vmatpush3.bf16.msra.mxu0 %v902_v54  ;;  %v944_v45 = vpack.c.bf16 %v405_v44, %v404_v43  ;;  %v953_v54 = vpack.c.bf16 %v490_v53, %v489_v51 }
  0x7d   :  { %904 = vmatprep.subr.bf16.mxu0 %v1106_v0 }
  0x80   :  { %906 = vmatpush3.bf16.msra.mxu0 %v905_v56 }
  0x81   :  { %907 = vmatprep.subr.bf16.mxu0 %v1106_v0 }
  0x84   :  { %909 = vmatpush3.bf16.msra.mxu0 %v908_v59  ;;  %v959_v59 = vpack.c.bf16 %v494_v58, %v493_v57 }
  0x85   :  { %910 = vmatprep.subr.bf16.mxu0 %v1106_v0 }
  0x88   :  { %912 = vmatpush3.bf16.msra.mxu0 %v911_v62  ;;  %v962_v62 = vpack.c.bf16 %v496_v61, %v495_v60 }
  0x89   :  { %913 = vmatprep.subr.bf16.mxu0 %v1106_v0 }
  0x8c   :  { %915 = vmatpush3.bf16.msra.mxu0 %v914_v3  ;;  %v965_v3 = vpack.c.bf16 %v498_v2, %v497_v63 }
  0x8d   :  { %916 = vmatprep.subr.bf16.mxu0 %v1106_v0 }
  0x90   :  { %918 = vmatpush3.bf16.msra.mxu0 %v917_v6 }
  0x91   :  { %919 = vmatprep.subr.bf16.mxu0 %v1106_v0 }
  0x94   :  { %921 = vmatpush3.bf16.msra.mxu0 %v920_v15  ;;  %v971_v15 = vpack.c.bf16 %v502_v14, %v501_v13 }
  0x95   :  { %922 = vmatprep.subr.bf16.mxu0 %v1106_v0 }
  0x98   :  { %924 = vmatpush3.bf16.msra.mxu0 %v923_v18 }
  0x99   :  { %949 = vmatprep.subr.bf16.mxu0 %v1106_v0 }
 0x14e   :  { %v196_v8 = vpop.f32.mrb[0].mxu0 }
 0x14f   :  { %v197_v9 = vadd.f32 %v588_v7, %v196_v8  ;;  %v712_v10 = vpop.f32.mrb[1].mxu0 }
 0x150   :  { %v499_v10 = vld [vmem:[#allocation9 + $0x60] sm:$0xff] }
 0x151   :  { %v200_v11 = vmul.f32 0.01, %v197_v9 }
 0x153   :  { %v201_v12 = vmax.f32 %v197_v9, %v200_v11  ;;  %v500_v11 = vld [vmem:[#allocation9 + $0x68] sm:$0xff] }
 0x155   :  { %746 = vmatmul.mubr.f32.vlgmr.msra.gmra.mrb[0].mxu1 %v201_v12  ;;  %v968_v12 = vpack.c.bf16 %v500_v11, %v499_v10 }
 0x156   :  { %815 = vmatprep.mubr.msk.f32.mxu1 %vm1107_vm0, %v1108_v1  ;;  %927 = vmatpush3.bf16.msra.mxu1 %v926_v22  ;;  %v592_v22 = vld [vmem:[%s1339_s10] ss:$0 sm:$0xff] }
 0x157   :  { %928 = vmatprep.subr.bf16.mxu1 %v1106_v0 }
 0x15a   :  { %930 = vmatpush3.bf16.msra.mxu1 %v929_v24 }
 0x15b   :  { %931 = vmatprep.subr.bf16.mxu1 %v1106_v0 }
 0x15e   :  { %933 = vmatpush3.bf16.msra.mxu1 %v932_v27 }
 0x15f   :  { %934 = vmatprep.subr.bf16.mxu1 %v1106_v0 }
 0x162   :  { %936 = vmatpush3.bf16.msra.mxu1 %v935_v30 }
 0x163   :  { %937 = vmatprep.subr.bf16.mxu1 %v1106_v0 }
 0x166   :  { %939 = vmatpush3.bf16.msra.mxu1 %v938_v33 }
 0x167   :  { %940 = vmatprep.subr.bf16.mxu1 %v1106_v0 }
 0x16a   :  { %942 = vmatpush3.bf16.msra.mxu1 %v941_v36 }
 0x16b   :  { %943 = vmatprep.subr.bf16.mxu1 %v1106_v0 }
 0x16e   :  { %945 = vmatpush3.bf16.msra.mxu1 %v944_v45 }
 0x16f   :  { %946 = vmatprep.subr.bf16.mxu1 %v1106_v0 }
 0x172   :  { %948 = vmatpush3.bf16.msra.mxu1 %v947_v48 }
 0x228   :  { %v291_v38 = vpop.f32.mrb[0].mxu1 }
 0x229   :  { %v292_v39 = vadd.f32 %v589_v37, %v291_v38  ;;  %v747_v40 = vpop.f32.mrb[1].mxu1 }
 0x22b   :  { %v295_v41 = vmul.f32 0.01, %v292_v39 }
 0x22d   :  { %v296_v42 = vmax.f32 %v292_v39, %v295_v41 }
 0x22f   :  { %781 = vmatmul.mubr.f32.vlgmr.msra.gmra.mrb[2].mxu0 %v296_v42 }
 0x230   :  { %850 = vmatprep.mubr.msk.f32.mxu0 %vm1107_vm0, %v1108_v1  ;;  %951 = vmatpush3.bf16.msra.mxu0 %v950_v52  ;;  %v491_v1 = vld [vmem:[#allocation9 + $0x20] sm:$0xff] }
 0x231   :  { %952 = vmatprep.subr.bf16.mxu0 %v1106_v0  ;;  %v956_v56 = vpack.c.bf16 %v492_v55, %v491_v1 }
 0x234   :  { %954 = vmatpush3.bf16.msra.mxu0 %v953_v54 }
 0x235   :  { %955 = vmatprep.subr.bf16.mxu0 %v1106_v0 }
 0x238   :  { %957 = vmatpush3.bf16.msra.mxu0 %v956_v56 }
 0x239   :  { %958 = vmatprep.subr.bf16.mxu0 %v1106_v0 }
 0x23c   :  { %960 = vmatpush3.bf16.msra.mxu0 %v959_v59 }
 0x23d   :  { %961 = vmatprep.subr.bf16.mxu0 %v1106_v0 }
 0x240   :  { %963 = vmatpush3.bf16.msra.mxu0 %v962_v62 }
 0x241   :  { %964 = vmatprep.subr.bf16.mxu0 %v1106_v0 }
 0x244   :  { %966 = vmatpush3.bf16.msra.mxu0 %v965_v3 }
 0x245   :  { %967 = vmatprep.subr.bf16.mxu0 %v1106_v0 }
 0x248   :  { %969 = vmatpush3.bf16.msra.mxu0 %v968_v12 }
 0x249   :  { %970 = vmatprep.subr.bf16.mxu0 %v1106_v0 }
 0x24c   :  { %972 = vmatpush3.bf16.msra.mxu0 %v971_v15 }
 0x302   :  { %v386_v5 = vpop.f32.mrb[2].mxu0 }
 0x303   :  { %v387_v6 = vadd.f32 %v590_v4, %v386_v5  ;;  %v782_v7 = vpop.f32.mrb[3].mxu0 }
 0x305   :  { %v390_v8 = vmul.f32 0.01, %v387_v6 }
 0x307   :  { %v391_v9 = vmax.f32 %v387_v6, %v390_v8 }
 0x309   :  { %816 = vmatmul.mubr.f32.vlgmr.msra.gmra.mrb[2].mxu1 %v391_v9 }
 0x3dc   :  { %v481_v17 = vpop.f32.mrb[2].mxu1 }
 0x3dd   :  { %v482_v18 = vadd.f32 %v591_v16, %v481_v17  ;;  %v817_v19 = vpop.f32.mrb[3].mxu1 }
 0x3df   :  { %v485_v20 = vmul.f32 0.01, %v482_v18 }
 0x3e1   :  { %v486_v21 = vmax.f32 %v482_v18, %v485_v20 }
 0x3e3   :  { %851 = vmatmul.mubr.f32.vlgmr.msra.gmra.mrb[4].mxu0 %v486_v21 }
 0x4b6   :  { %v576_v23 = vpop.f32.mrb[4].mxu0 }
 0x4b7   :  { %v577_v0 = vadd.f32 %v592_v22, %v576_v23  ;;  %v852_v24 = vpop.f32.mrb[5].mxu0 }
 0x4b9   :  { %580 = vst [vmem:[%s1340_s11] sm:$0xff] %v577_v0 }
 0x4ba   :  { %585 = vsyncpa [#allocation3], 1 }
 0x4bb   :  { %586 = vsyncpa [#allocation5], 1 }
 0x4bc   :  { %587 = vsyncpa [#allocation8], 1 }

// kernel: _feedforward_impl.1
= control target key start
LH: loop header
LB: loop body
LE: loop exit
PB: predicated region body
PF: predicated region fallthrough
CT: control target
= control target key end

     0   :  { %16 = vsyncpa [#allocation3], 0  ;;  %s1329_s0 = inlined_call_operand.vmem [shape: f32[8,128], index: 0, kind: input, shape index: {}]   ;;  %s1330_s1 = inlined_call_operand.hbm [shape: f32[128,128], index: 1, kind: input, shape index: {}]   ;;  %s1331_s2 = inlined_call_operand.vmem [shape: f32[1,128], index: 2, kind: input, shape index: {}]   ;;  %s1332_s3 = inlined_call_operand.hbm [shape: f32[128,128], index: 3, kind: input, shape index: {}]   ;;  %s1333_s4 = inlined_call_operand.vmem [shape: f32[1,128], index: 4, kind: input, shape index: {}]   ;;  %s1334_s5 = inlined_call_operand.hbm [shape: f32[128,128], index: 5, kind: input, shape index: {}]   ;;  %s1335_s6 = inlined_call_operand.vmem [shape: f32[1,128], index: 6, kind: input, shape index: {}]   ;;  %s1336_s7 = inlined_call_operand.hbm [shape: f32[128,128], index: 7, kind: input, shape index: {}]   ;;  %s1337_s8 = inlined_call_operand.vmem [shape: f32[1,128], index: 8, kind: input, shape index: {}]   ;;  %s1338_s9 = inlined_call_operand.hbm [shape: f32[128,128], index: 9, kind: input, shape index: {}]   ;;  %s1339_s10 = inlined_call_operand.vmem [shape: f32[1,128], index: 10, kind: input, shape index: {}]   ;;  %s1340_s11 = inlined_call_operand.vmem [shape: f32[8,128], index: 11, kind: output, shape index: {}]  }
   0x1   :  { %17 = vsyncpa [#allocation5], 0 }
   0x2   :  { %18 = vsyncpa [#allocation8], 0  ;;  %s1099_s17 = smov [#allocation4]   ;;  %s1100_s19 = smov [#allocation7]  }
   0x3   :  { %s40_s18 = sshll.u32 %s1099_s17, 4  ;;  %s68_s20 = sshll.u32 %s1100_s19, 4  ;;  %s41_s18 = int_to_ptr.vmem [resolvable:$true] %s40_s18  ;;  %s1169_s20 = int_to_ptr.vmem [resolvable:$true] %s68_s20 }
   0x4   :  { %s983_s23 = scalar_lea.hbm %s1332_s3, 2048 }
   0x5   :  { %p984_p0 = scmp.ne.s32.totalorder %s1332_s3, %s983_s23  ;;  %p987_p1 = scmp.lt.u32.totalorder %s983_s23, %s1332_s3 }
   0x7   :  { %p989_p2 = pnand %p987_p1, %p984_p0 }
   0x9   :  { %992 = shalt.err (!%p989_p2)
}
   0xa   :  { %s993_s28 = scalar_lea.vmem %s41_s18, 2048  ;;  %p998_p4 = scmp.lt.s32.totalorder %s41_s18, %s41_s18 }
   0xb   :  { %p994_p3 = scmp.ne.s32.totalorder %s41_s18, %s993_s28  ;;  %p999_p5 = scmp.lt.s32.totalorder %s993_s28, %s993_s28 }
   0xd   :  { %p1000_p6 = por %p999_p5, %p998_p4 }
   0xf   :  { %p1001_p7 = pnand %p1000_p6, %p994_p3 }
  0x11   :  { %1004 = shalt.err (!%p1001_p7)
}
  0x12   :  { %s1101_s29 = smov 128   ;;  %s1102_s30 = smov 8  }
  0x13   :  { %46 = dma.hbm_to_vmem [thread:$0]  %s1332_s3, 2048, %s41_s18, [#allocation5], %s1101_s29, %s1101_s29, %s1102_s30  }
  0x14   :  { %s1005_s16 = scalar_lea.hbm %s1336_s7, 2048 }
  0x15   :  { %p1006_p8 = scmp.ne.s32.totalorder %s1336_s7, %s1005_s16  ;;  %p1009_p9 = scmp.lt.u32.totalorder %s1005_s16, %s1336_s7 }
  0x17   :  { %p1011_p10 = pnand %p1009_p9, %p1006_p8 }
  0x19   :  { %1014 = shalt.err (!%p1011_p10)
}
  0x1a   :  { %s1015_s23 = scalar_lea.vmem %s1169_s20, 2048  ;;  %p1020_p12 = scmp.lt.s32.totalorder %s1169_s20, %s1169_s20 }
  0x1b   :  { %p1016_p11 = scmp.ne.s32.totalorder %s1169_s20, %s1015_s23  ;;  %p1021_p13 = scmp.lt.s32.totalorder %s1015_s23, %s1015_s23 }
  0x1d   :  { %p1022_p0 = por %p1021_p13, %p1020_p12 }
  0x1f   :  { %p1023_p1 = pnand %p1022_p0, %p1016_p11 }
  0x21   :  { %1026 = shalt.err (!%p1023_p1)
}
  0x22   :  { %74 = dma.hbm_to_vmem [thread:$0]  %s1336_s7, 2048, %s1169_s20, [#allocation8], %s1101_s29, %s1101_s29, %s1102_s30  }
  0x23   :  { %s1103_s24 = smov [#allocation2]   ;;  %s1104_s26 = smov [#allocation6]  }
  0x24   :  { %s26_s25 = sshll.u32 %s1103_s24, 4  ;;  %s54_s27 = sshll.u32 %s1104_s26, 4  ;;  %s27_s25 = int_to_ptr.vmem [resolvable:$true] %s26_s25  ;;  %s1206_s27 = int_to_ptr.vmem [resolvable:$true] %s54_s27 }
  0x25   :  { %s1027_s13 = scalar_lea.hbm %s1330_s1, 2048 }
  0x26   :  { %p1028_p2 = scmp.ne.s32.totalorder %s1330_s1, %s1027_s13  ;;  %p1031_p3 = scmp.lt.u32.totalorder %s1027_s13, %s1330_s1 }
  0x28   :  { %p1033_p4 = pnand %p1031_p3, %p1028_p2 }
  0x2a   :  { %1036 = shalt.err (!%p1033_p4)
}
  0x2b   :  { %s1037_s7 = scalar_lea.vmem %s27_s25, 2048  ;;  %p1042_p6 = scmp.lt.s32.totalorder %s27_s25, %s27_s25 }
  0x2c   :  { %p1038_p5 = scmp.ne.s32.totalorder %s27_s25, %s1037_s7  ;;  %p1043_p7 = scmp.lt.s32.totalorder %s1037_s7, %s1037_s7 }
  0x2e   :  { %p1044_p8 = por %p1043_p7, %p1042_p6 }
  0x30   :  { %p1045_p9 = pnand %p1044_p8, %p1038_p5 }
  0x32   :  { %1048 = shalt.err (!%p1045_p9)
}
  0x33   :  { %32 = dma.hbm_to_vmem [thread:$0]  %s1330_s1, 2048, %s27_s25, [#allocation3], %s1101_s29, %s1101_s29, %s1102_s30  }
  0x34   :  { %s1049_s23 = scalar_lea.hbm %s1334_s5, 2048 }
  0x35   :  { %p1050_p10 = scmp.ne.s32.totalorder %s1334_s5, %s1049_s23  ;;  %p1053_p11 = scmp.lt.u32.totalorder %s1049_s23, %s1334_s5 }
  0x37   :  { %p1055_p12 = pnand %p1053_p11, %p1050_p10 }
  0x39   :  { %1058 = shalt.err (!%p1055_p12)
}
  0x3a   :  { %s1059_s28 = scalar_lea.vmem %s1206_s27, 2048  ;;  %p1064_p0 = scmp.lt.s32.totalorder %s1206_s27, %s1206_s27 }
  0x3b   :  { %p1060_p13 = scmp.ne.s32.totalorder %s1206_s27, %s1059_s28  ;;  %p1065_p1 = scmp.lt.s32.totalorder %s1059_s28, %s1059_s28 }
  0x3d   :  { %p1066_p2 = por %p1065_p1, %p1064_p0 }
  0x3f   :  { %p1067_p3 = pnand %p1066_p2, %p1060_p13 }
  0x41   :  { %1070 = shalt.err (!%p1067_p3)
}
  0x42   :  { %60 = dma.hbm_to_vmem [thread:$0]  %s1334_s5, 2048, %s1206_s27, [#allocation5], %s1101_s29, %s1101_s29, %s1102_s30  }
  0x43   :  { %s1105_s12 = smov [#allocation9]   ;;  %s1071_s16 = scalar_lea.hbm %s1338_s9, 2048 }
  0x44   :  { %s82_s13 = sshll.u32 %s1105_s12, 4  ;;  %p1072_p4 = scmp.ne.s32.totalorder %s1338_s9, %s1071_s16  ;;  %s83_s13 = int_to_ptr.vmem [resolvable:$true] %s82_s13 }
  0x45   :  { %p1075_p5 = scmp.lt.u32.totalorder %s1071_s16, %s1338_s9 }
  0x47   :  { %p1077_p6 = pnand %p1075_p5, %p1072_p4 }
  0x49   :  { %1080 = shalt.err (!%p1077_p6)
}
  0x4a   :  { %s1081_s21 = scalar_lea.vmem %s83_s13, 2048  ;;  %p1086_p8 = scmp.lt.s32.totalorder %s83_s13, %s83_s13 }
  0x4b   :  { %p1082_p7 = scmp.ne.s32.totalorder %s83_s13, %s1081_s21  ;;  %p1087_p9 = scmp.lt.s32.totalorder %s1081_s21, %s1081_s21 }
  0x4d   :  { %p1088_p10 = por %p1087_p9, %p1086_p8 }
  0x4f   :  { %p1089_p11 = pnand %p1088_p10, %p1082_p7 }
  0x51   :  { %1092 = shalt.err (!%p1089_p11)
}
  0x52   :  { %88 = dma.hbm_to_vmem [thread:$0]  %s1338_s9, 2048, %s83_s13, [#allocation8], %s1101_s29, %s1101_s29, %s1102_s30  }
  0x53   :  { %1093 = dma.done.wait [#allocation3], 2048  }
  0x54   :  { %1094 = vsyncadd [#allocation3], 4294965248 }
  0x55   :  { %1095 = dma.done.wait [#allocation5], 4096  }
  0x56   :  { %1096 = vsyncadd [#allocation5], 4294963200 }
  0x57   :  { %1097 = dma.done.wait [#allocation8], 4096  }
  0x58   :  { %1098 = vsyncadd [#allocation8], 4294963200  ;;  %v1106_v0 = vmov 0.0|0.0   ;;  %vm1107_vm0 = vmmov 0   ;;  %v1108_v1 = vmov 0.0   ;;  %v107_v2 = vld [vmem:[#allocation2] sm:$0xff] }
  0x59   :  { %853 = vmatprep.subr.bf16.mxu0 %v1106_v0  ;;  %710 = vmatprep.mubr.msk.f32.mxu0 %vm1107_vm0, %v1108_v1  ;;  %v108_v3 = vld [vmem:[#allocation2 + $0x8] sm:$0xff]  ;;  %v109_v4 = vld [vmem:[#allocation2 + $0x10] sm:$0xff]  ;;  %v110_v6 = vld [vmem:[#allocation2 + $0x18] sm:$0xff] }
  0x5a   :  { %877 = vmatprep.subr.bf16.mxu1 %v1106_v0  ;;  %745 = vmatprep.mubr.msk.f32.mxu1 %vm1107_vm0, %v1108_v1  ;;  %v854_v5 = vpack.c.bf16 %v108_v3, %v107_v2  ;;  %v857_v7 = vpack.c.bf16 %v110_v6, %v109_v4  ;;  %v111_v8 = vld [vmem:[#allocation2 + $0x20] sm:$0xff]  ;;  %v112_v9 = vld [vmem:[#allocation2 + $0x28] sm:$0xff]  ;;  %v204_v12 = vld [vmem:[#allocation4 + $0x10] sm:$0xff] }
  0x5b   :  { %v202_v10 = vld [vmem:[#allocation4] sm:$0xff]  ;;  %v203_v11 = vld [vmem:[#allocation4 + $0x8] sm:$0xff]  ;;  %v205_v13 = vld [vmem:[#allocation4 + $0x18] sm:$0xff]  ;;  %v860_v14 = vpack.c.bf16 %v112_v9, %v111_v8 }
  0x5c   :  { %855 = vmatpush3.bf16.msra.mxu0 %v854_v5  ;;  %v878_v15 = vpack.c.bf16 %v203_v11, %v202_v10  ;;  %v113_v16 = vld [vmem:[#allocation2 + $0x30] sm:$0xff]  ;;  %v114_v17 = vld [vmem:[#allocation2 + $0x38] sm:$0xff]  ;;  %v881_v18 = vpack.c.bf16 %v205_v13, %v204_v12  ;;  %v206_v19 = vld [vmem:[#allocation4 + $0x20] sm:$0xff] }
  0x5d   :  { %856 = vmatprep.subr.bf16.mxu0 %v1106_v0  ;;  %v207_v20 = vld [vmem:[#allocation4 + $0x28] sm:$0xff]  ;;  %v863_v21 = vpack.c.bf16 %v114_v17, %v113_v16  ;;  %v115_v22 = vld [vmem:[#allocation2 + $0x40] sm:$0xff]  ;;  %v208_v25 = vld [vmem:[#allocation4 + $0x30] sm:$0xff] }
  0x5e   :  { %879 = vmatpush3.bf16.msra.mxu1 %v878_v15  ;;  %v116_v23 = vld [vmem:[#allocation2 + $0x48] sm:$0xff]  ;;  %v884_v24 = vpack.c.bf16 %v207_v20, %v206_v19  ;;  %v209_v26 = vld [vmem:[#allocation4 + $0x38] sm:$0xff]  ;;  %v117_v28 = vld [vmem:[#allocation2 + $0x50] sm:$0xff] }
  0x5f   :  { %880 = vmatprep.subr.bf16.mxu1 %v1106_v0  ;;  %v866_v27 = vpack.c.bf16 %v116_v23, %v115_v22  ;;  %v118_v29 = vld [vmem:[#allocation2 + $0x58] sm:$0xff]  ;;  %v887_v30 = vpack.c.bf16 %v209_v26, %v208_v25  ;;  %v210_v31 = vld [vmem:[#allocation4 + $0x40] sm:$0xff]  ;;  %v211_v32 = vld [vmem:[#allocation4 + $0x48] sm:$0xff] }
  0x60   :  { %858 = vmatpush3.bf16.msra.mxu0 %v857_v7  ;;  %v869_v33 = vpack.c.bf16 %v118_v29, %v117_v28  ;;  %v119_v34 = vld [vmem:[#allocation2 + $0x60] sm:$0xff]  ;;  %v120_v35 = vld [vmem:[#allocation2 + $0x68] sm:$0xff]  ;;  %v890_v36 = vpack.c.bf16 %v211_v32, %v210_v31  ;;  %v212_v37 = vld [vmem:[#allocation4 + $0x50] sm:$0xff] }
  0x61   :  { %859 = vmatprep.subr.bf16.mxu0 %v1106_v0  ;;  %v213_v38 = vld [vmem:[#allocation4 + $0x58] sm:$0xff]  ;;  %v872_v39 = vpack.c.bf16 %v120_v35, %v119_v34  ;;  %v121_v40 = vld [vmem:[#allocation2 + $0x70] sm:$0xff]  ;;  %v106_v44 = vld [vmem:[%s1329_s0] sm:$0xff] }
  0x62   :  { %882 = vmatpush3.bf16.msra.mxu1 %v881_v18  ;;  %v122_v41 = vld [vmem:[#allocation2 + $0x78] sm:$0xff]  ;;  %v893_v42 = vpack.c.bf16 %v213_v38, %v212_v37  ;;  %v214_v45 = vld [vmem:[#allocation4 + $0x60] sm:$0xff]  ;;  %v215_v46 = vld [vmem:[#allocation4 + $0x68] sm:$0xff] }
  0x63   :  { %883 = vmatprep.subr.bf16.mxu1 %v1106_v0  ;;  %v875_v43 = vpack.c.bf16 %v122_v41, %v121_v40  ;;  %v896_v47 = vpack.c.bf16 %v215_v46, %v214_v45  ;;  %v216_v48 = vld [vmem:[#allocation4 + $0x70] sm:$0xff]  ;;  %v217_v49 = vld [vmem:[#allocation4 + $0x78] sm:$0xff]  ;;  %v297_v51 = vld [vmem:[#allocation6] sm:$0xff] }
  0x64   :  { %861 = vmatpush3.bf16.msra.mxu0 %v860_v14  ;;  %v899_v50 = vpack.c.bf16 %v217_v49, %v216_v48  ;;  %v298_v52 = vld [vmem:[#allocation6 + $0x8] sm:$0xff]  ;;  %v299_v53 = vld [vmem:[#allocation6 + $0x10] sm:$0xff]  ;;  %v300_v55 = vld [vmem:[#allocation6 + $0x18] sm:$0xff] }
  0x65   :  { %862 = vmatprep.subr.bf16.mxu0 %v1106_v0  ;;  %v902_v54 = vpack.c.bf16 %v298_v52, %v297_v51  ;;  %v905_v56 = vpack.c.bf16 %v300_v55, %v299_v53  ;;  %v301_v57 = vld [vmem:[#allocation6 + $0x20] sm:$0xff]  ;;  %v302_v58 = vld [vmem:[#allocation6 + $0x28] sm:$0xff]  ;;  %v303_v60 = vld [vmem:[#allocation6 + $0x30] sm:$0xff] }
  0x66   :  { %885 = vmatpush3.bf16.msra.mxu1 %v884_v24  ;;  %v908_v59 = vpack.c.bf16 %v302_v58, %v301_v57  ;;  %v304_v61 = vld [vmem:[#allocation6 + $0x38] sm:$0xff]  ;;  %v305_v63 = vld [vmem:[#allocation6 + $0x40] sm:$0xff]  ;;  %v306_v2 = vld [vmem:[#allocation6 + $0x48] sm:$0xff] }
  0x67   :  { %886 = vmatprep.subr.bf16.mxu1 %v1106_v0  ;;  %v911_v62 = vpack.c.bf16 %v304_v61, %v303_v60  ;;  %v914_v3 = vpack.c.bf16 %v306_v2, %v305_v63  ;;  %v307_v4 = vld [vmem:[#allocation6 + $0x50] sm:$0xff]  ;;  %v308_v5 = vld [vmem:[#allocation6 + $0x58] sm:$0xff]  ;;  %v588_v7 = vld [vmem:[%s1331_s2] ss:$0 sm:$0xff] }
  0x68   :  { %864 = vmatpush3.bf16.msra.mxu0 %v863_v21  ;;  %v917_v6 = vpack.c.bf16 %v308_v5, %v307_v4  ;;  %v309_v13 = vld [vmem:[#allocation6 + $0x60] sm:$0xff]  ;;  %v310_v14 = vld [vmem:[#allocation6 + $0x68] sm:$0xff]  ;;  %v311_v16 = vld [vmem:[#allocation6 + $0x70] sm:$0xff] }
  0x69   :  { %865 = vmatprep.subr.bf16.mxu0 %v1106_v0  ;;  %v920_v15 = vpack.c.bf16 %v310_v14, %v309_v13  ;;  %v312_v17 = vld [vmem:[#allocation6 + $0x78] sm:$0xff]  ;;  %v392_v19 = vld [vmem:[#allocation7] sm:$0xff]  ;;  %v393_v20 = vld [vmem:[#allocation7 + $0x8] sm:$0xff] }
  0x6a   :  { %888 = vmatpush3.bf16.msra.mxu1 %v887_v30  ;;  %v923_v18 = vpack.c.bf16 %v312_v17, %v311_v16  ;;  %v394_v21 = vld [vmem:[#allocation7 + $0x10] sm:$0xff]  ;;  %v926_v22 = vpack.c.bf16 %v393_v20, %v392_v19  ;;  %v395_v23 = vld [vmem:[#allocation7 + $0x18] sm:$0xff]  ;;  %v396_v25 = vld [vmem:[#allocation7 + $0x20] sm:$0xff] }
  0x6b   :  { %889 = vmatprep.subr.bf16.mxu1 %v1106_v0  ;;  %v929_v24 = vpack.c.bf16 %v395_v23, %v394_v21  ;;  %v397_v26 = vld [vmem:[#allocation7 + $0x28] sm:$0xff]  ;;  %v398_v28 = vld [vmem:[#allocation7 + $0x30] sm:$0xff]  ;;  %v399_v29 = vld [vmem:[#allocation7 + $0x38] sm:$0xff] }
  0x6c   :  { %867 = vmatpush3.bf16.msra.mxu0 %v866_v27  ;;  %v932_v27 = vpack.c.bf16 %v397_v26, %v396_v25  ;;  %v935_v30 = vpack.c.bf16 %v399_v29, %v398_v28  ;;  %v400_v31 = vld [vmem:[#allocation7 + $0x40] sm:$0xff]  ;;  %v401_v32 = vld [vmem:[#allocation7 + $0x48] sm:$0xff]  ;;  %v402_v34 = vld [vmem:[#allocation7 + $0x50] sm:$0xff] }
  0x6d   :  { %868 = vmatprep.subr.bf16.mxu0 %v1106_v0  ;;  %v403_v35 = vld [vmem:[#allocation7 + $0x58] sm:$0xff]  ;;  %v589_v37 = vld [vmem:[%s1333_s4] ss:$0 sm:$0xff]  ;;  %v406_v46 = vld [vmem:[#allocation7 + $0x70] sm:$0xff] }
  0x6e   :  { %891 = vmatpush3.bf16.msra.mxu1 %v890_v36  ;;  %v941_v36 = vpack.c.bf16 %v403_v35, %v402_v34  ;;  %v487_v49 = vld [vmem:[#allocation9] sm:$0xff]  ;;  %v489_v51 = vld [vmem:[#allocation9 + $0x10] sm:$0xff]  ;;  %v490_v53 = vld [vmem:[#allocation9 + $0x18] sm:$0xff] }
  0x6f   :  { %892 = vmatprep.subr.bf16.mxu1 %v1106_v0  ;;  %v492_v55 = vld [vmem:[#allocation9 + $0x28] sm:$0xff]  ;;  %v493_v57 = vld [vmem:[#allocation9 + $0x30] sm:$0xff]  ;;  %v494_v58 = vld [vmem:[#allocation9 + $0x38] sm:$0xff] }
  0x70   :  { %870 = vmatpush3.bf16.msra.mxu0 %v869_v33  ;;  %v938_v33 = vpack.c.bf16 %v401_v32, %v400_v31  ;;  %v495_v60 = vld [vmem:[#allocation9 + $0x40] sm:$0xff]  ;;  %v496_v61 = vld [vmem:[#allocation9 + $0x48] sm:$0xff]  ;;  %v497_v63 = vld [vmem:[#allocation9 + $0x50] sm:$0xff] }
  0x71   :  { %871 = vmatprep.subr.bf16.mxu0 %v1106_v0  ;;  %v498_v2 = vld [vmem:[#allocation9 + $0x58] sm:$0xff]  ;;  %v590_v4 = vld [vmem:[%s1335_s6] ss:$0 sm:$0xff]  ;;  %v501_v13 = vld [vmem:[#allocation9 + $0x70] sm:$0xff] }
  0x72   :  { %894 = vmatpush3.bf16.msra.mxu1 %v893_v42  ;;  %v502_v14 = vld [vmem:[#allocation9 + $0x78] sm:$0xff]  ;;  %v591_v16 = vld [vmem:[%s1337_s8] ss:$0 sm:$0xff] }
  0x73   :  { %895 = vmatprep.subr.bf16.mxu1 %v1106_v0 }
  0x74   :  { %873 = vmatpush3.bf16.msra.mxu0 %v872_v39 }
  0x75   :  { %874 = vmatprep.subr.bf16.mxu0 %v1106_v0 }
  0x76   :  { %897 = vmatpush3.bf16.msra.mxu1 %v896_v47  ;;  %v407_v47 = vld [vmem:[#allocation7 + $0x78] sm:$0xff] }
  0x77   :  { %898 = vmatprep.subr.bf16.mxu1 %v1106_v0  ;;  %v947_v48 = vpack.c.bf16 %v407_v47, %v406_v46 }
  0x78   :  { %876 = vmatpush3.bf16.msra.mxu0 %v875_v43  ;;  %v404_v43 = vld [vmem:[#allocation7 + $0x60] sm:$0xff] }
  0x79   :  { %901 = vmatprep.subr.bf16.mxu0 %v1106_v0 }
  0x7a   :  { %900 = vmatpush3.bf16.msra.mxu1 %v899_v50  ;;  %v488_v50 = vld [vmem:[#allocation9 + $0x8] sm:$0xff] }
  0x7b   :  { %711 = vmatmul.mubr.f32.vlgmr.msra.gmra.mrb[0].mxu0 %v106_v44  ;;  %925 = vmatprep.subr.bf16.mxu1 %v1106_v0  ;;  %v405_v44 = vld [vmem:[#allocation7 + $0x68] sm:$0xff]  ;;  %v950_v52 = vpack.c.bf16 %v488_v50, %v487_v49 }
  0x7c   :  { %780 = vmatprep.mubr.msk.f32.mxu0 %vm1107_vm0, %v1108_v1  ;;  %903 = vmatpush3.bf16.msra.mxu0 %v902_v54  ;;  %v944_v45 = vpack.c.bf16 %v405_v44, %v404_v43  ;;  %v953_v54 = vpack.c.bf16 %v490_v53, %v489_v51 }
  0x7d   :  { %904 = vmatprep.subr.bf16.mxu0 %v1106_v0 }
  0x80   :  { %906 = vmatpush3.bf16.msra.mxu0 %v905_v56 }
  0x81   :  { %907 = vmatprep.subr.bf16.mxu0 %v1106_v0 }
  0x84   :  { %909 = vmatpush3.bf16.msra.mxu0 %v908_v59  ;;  %v959_v59 = vpack.c.bf16 %v494_v58, %v493_v57 }
  0x85   :  { %910 = vmatprep.subr.bf16.mxu0 %v1106_v0 }
  0x88   :  { %912 = vmatpush3.bf16.msra.mxu0 %v911_v62  ;;  %v962_v62 = vpack.c.bf16 %v496_v61, %v495_v60 }
  0x89   :  { %913 = vmatprep.subr.bf16.mxu0 %v1106_v0 }
  0x8c   :  { %915 = vmatpush3.bf16.msra.mxu0 %v914_v3  ;;  %v965_v3 = vpack.c.bf16 %v498_v2, %v497_v63 }
  0x8d   :  { %916 = vmatprep.subr.bf16.mxu0 %v1106_v0 }
  0x90   :  { %918 = vmatpush3.bf16.msra.mxu0 %v917_v6 }
  0x91   :  { %919 = vmatprep.subr.bf16.mxu0 %v1106_v0 }
  0x94   :  { %921 = vmatpush3.bf16.msra.mxu0 %v920_v15  ;;  %v971_v15 = vpack.c.bf16 %v502_v14, %v501_v13 }
  0x95   :  { %922 = vmatprep.subr.bf16.mxu0 %v1106_v0 }
  0x98   :  { %924 = vmatpush3.bf16.msra.mxu0 %v923_v18 }
  0x99   :  { %949 = vmatprep.subr.bf16.mxu0 %v1106_v0 }
 0x14e   :  { %v196_v8 = vpop.f32.mrb[0].mxu0 }
 0x14f   :  { %v197_v9 = vadd.f32 %v588_v7, %v196_v8  ;;  %v712_v10 = vpop.f32.mrb[1].mxu0 }
 0x150   :  { %v499_v10 = vld [vmem:[#allocation9 + $0x60] sm:$0xff] }
 0x151   :  { %v200_v11 = vmul.f32 0.01, %v197_v9 }
 0x153   :  { %v201_v12 = vmax.f32 %v197_v9, %v200_v11  ;;  %v500_v11 = vld [vmem:[#allocation9 + $0x68] sm:$0xff] }
 0x155   :  { %746 = vmatmul.mubr.f32.vlgmr.msra.gmra.mrb[0].mxu1 %v201_v12  ;;  %v968_v12 = vpack.c.bf16 %v500_v11, %v499_v10 }
 0x156   :  { %815 = vmatprep.mubr.msk.f32.mxu1 %vm1107_vm0, %v1108_v1  ;;  %927 = vmatpush3.bf16.msra.mxu1 %v926_v22  ;;  %v592_v22 = vld [vmem:[%s1339_s10] ss:$0 sm:$0xff] }
 0x157   :  { %928 = vmatprep.subr.bf16.mxu1 %v1106_v0 }
 0x15a   :  { %930 = vmatpush3.bf16.msra.mxu1 %v929_v24 }
 0x15b   :  { %931 = vmatprep.subr.bf16.mxu1 %v1106_v0 }
 0x15e   :  { %933 = vmatpush3.bf16.msra.mxu1 %v932_v27 }
 0x15f   :  { %934 = vmatprep.subr.bf16.mxu1 %v1106_v0 }
 0x162   :  { %936 = vmatpush3.bf16.msra.mxu1 %v935_v30 }
 0x163   :  { %937 = vmatprep.subr.bf16.mxu1 %v1106_v0 }
 0x166   :  { %939 = vmatpush3.bf16.msra.mxu1 %v938_v33 }
 0x167   :  { %940 = vmatprep.subr.bf16.mxu1 %v1106_v0 }
 0x16a   :  { %942 = vmatpush3.bf16.msra.mxu1 %v941_v36 }
 0x16b   :  { %943 = vmatprep.subr.bf16.mxu1 %v1106_v0 }
 0x16e   :  { %945 = vmatpush3.bf16.msra.mxu1 %v944_v45 }
 0x16f   :  { %946 = vmatprep.subr.bf16.mxu1 %v1106_v0 }
 0x172   :  { %948 = vmatpush3.bf16.msra.mxu1 %v947_v48 }
 0x228   :  { %v291_v38 = vpop.f32.mrb[0].mxu1 }
 0x229   :  { %v292_v39 = vadd.f32 %v589_v37, %v291_v38  ;;  %v747_v40 = vpop.f32.mrb[1].mxu1 }
 0x22b   :  { %v295_v41 = vmul.f32 0.01, %v292_v39 }
 0x22d   :  { %v296_v42 = vmax.f32 %v292_v39, %v295_v41 }
 0x22f   :  { %781 = vmatmul.mubr.f32.vlgmr.msra.gmra.mrb[2].mxu0 %v296_v42 }
 0x230   :  { %850 = vmatprep.mubr.msk.f32.mxu0 %vm1107_vm0, %v1108_v1  ;;  %951 = vmatpush3.bf16.msra.mxu0 %v950_v52  ;;  %v491_v1 = vld [vmem:[#allocation9 + $0x20] sm:$0xff] }
 0x231   :  { %952 = vmatprep.subr.bf16.mxu0 %v1106_v0  ;;  %v956_v56 = vpack.c.bf16 %v492_v55, %v491_v1 }
 0x234   :  { %954 = vmatpush3.bf16.msra.mxu0 %v953_v54 }
 0x235   :  { %955 = vmatprep.subr.bf16.mxu0 %v1106_v0 }
 0x238   :  { %957 = vmatpush3.bf16.msra.mxu0 %v956_v56 }
 0x239   :  { %958 = vmatprep.subr.bf16.mxu0 %v1106_v0 }
 0x23c   :  { %960 = vmatpush3.bf16.msra.mxu0 %v959_v59 }
 0x23d   :  { %961 = vmatprep.subr.bf16.mxu0 %v1106_v0 }
 0x240   :  { %963 = vmatpush3.bf16.msra.mxu0 %v962_v62 }
 0x241   :  { %964 = vmatprep.subr.bf16.mxu0 %v1106_v0 }
 0x244   :  { %966 = vmatpush3.bf16.msra.mxu0 %v965_v3 }
 0x245   :  { %967 = vmatprep.subr.bf16.mxu0 %v1106_v0 }
 0x248   :  { %969 = vmatpush3.bf16.msra.mxu0 %v968_v12 }
 0x249   :  { %970 = vmatprep.subr.bf16.mxu0 %v1106_v0 }
 0x24c   :  { %972 = vmatpush3.bf16.msra.mxu0 %v971_v15 }
 0x302   :  { %v386_v5 = vpop.f32.mrb[2].mxu0 }
 0x303   :  { %v387_v6 = vadd.f32 %v590_v4, %v386_v5  ;;  %v782_v7 = vpop.f32.mrb[3].mxu0 }
 0x305   :  { %v390_v8 = vmul.f32 0.01, %v387_v6 }
 0x307   :  { %v391_v9 = vmax.f32 %v387_v6, %v390_v8 }
 0x309   :  { %816 = vmatmul.mubr.f32.vlgmr.msra.gmra.mrb[2].mxu1 %v391_v9 }
 0x3dc   :  { %v481_v17 = vpop.f32.mrb[2].mxu1 }
 0x3dd   :  { %v482_v18 = vadd.f32 %v591_v16, %v481_v17  ;;  %v817_v19 = vpop.f32.mrb[3].mxu1 }
 0x3df   :  { %v485_v20 = vmul.f32 0.01, %v482_v18 }
 0x3e1   :  { %v486_v21 = vmax.f32 %v482_v18, %v485_v20 }
 0x3e3   :  { %851 = vmatmul.mubr.f32.vlgmr.msra.gmra.mrb[4].mxu0 %v486_v21 }
 0x4b6   :  { %v576_v23 = vpop.f32.mrb[4].mxu0 }
 0x4b7   :  { %v577_v0 = vadd.f32 %v592_v22, %v576_v23  ;;  %v852_v24 = vpop.f32.mrb[5].mxu0 }
 0x4b9   :  { %580 = vst [vmem:[%s1340_s11] sm:$0xff] %v577_v0 }
 0x4ba   :  { %585 = vsyncpa [#allocation3], 1 }
 0x4bb   :  { %586 = vsyncpa [#allocation5], 1 }
 0x4bc   :  { %587 = vsyncpa [#allocation8], 1 }

</bundles_post_ra>
